<compile_context>
chip_gen: v7x
topology: tpu7x:2x2x1
jax: 0.10.0
libtpu: 0.0.40
codegen_flags: <defaults>
</compile_context>

<pallas_src>
import functools
import math

import jax
import jax.numpy as jnp
from jax.experimental import pallas as pl
from jax.experimental.pallas import tpu as pltpu

NPAD = 128   # lane-dense padded logits width
SUB = 8      # sublane-aligned logits rows


# ---------------------------------------------------------------------------
# In-kernel helpers
# ---------------------------------------------------------------------------
def _mm(a, b):
    """MXU matmul: bf16 operands (no-op cast if already bf16), f32 accumulation."""
    return jnp.dot(a.astype(jnp.bfloat16), b.astype(jnp.bfloat16),
                   preferred_element_type=jnp.float32)


def _mm_t(a, b):
    """a @ b.T without materializing the transpose: MXU consumes RHS transposed."""
    return jax.lax.dot_general(
        a.astype(jnp.bfloat16), b.astype(jnp.bfloat16),
        dimension_numbers=(((1,), (1,)), ((), ())),
        preferred_element_type=jnp.float32)


def _layernorm(x, g, b, eps):
    mu = jnp.mean(x, axis=-1, keepdims=True)
    var = jnp.mean((x - mu) * (x - mu), axis=-1, keepdims=True)
    return (x - mu) * jax.lax.rsqrt(var + eps) * g + b


def _gelu(x):
    # tanh-approximate GELU, VPU/EUP only.
    # TODO(synk): HF BERT default is the exact erf GELU; swap in erf for exact parity.
    c = math.sqrt(2.0 / math.pi)
    return 0.5 * x * (1.0 + jnp.tanh(c * (x + 0.044715 * x * x * x)))


# ---------------------------------------------------------------------------
# Pallas kernel: one grid step = (batch b, encoder layer l)
# ---------------------------------------------------------------------------
def encoder_kernel(x_ref, mask_ref, embg_ref, embb_ref,
                   wqkv_ref, bqkv_ref, wo_ref, bo_ref, ln1g_ref, ln1b_ref,
                   wi_ref, bi_ref, wo2_ref, bo2_ref, ln2g_ref, ln2b_ref,
                   pw_ref, pb_ref, fw_ref, fb_ref,
                   o_ref,
                   x_vmem, qkv_vmem, ctx_vmem,
                   *, nH, dh, eps):
    H = nH * dh
    layer = pl.program_id(1)

    # Layer 0: embedding LayerNorm (no residual); park this batch's activation in VMEM.
    @pl.when(layer == 0)
    def _():
        x_vmem[...] = _layernorm(x_ref[...].astype(jnp.float32),
                                 embg_ref[...], embb_ref[...], eps)

    x = x_vmem[...]                                                  # (S, H) f32

    # ---- fused QKV projection: one (H, 3H) matmul; result staged in bf16 ----
    qkv_vmem[...] = (_mm(x, wqkv_ref[...]) + bqkv_ref[...]).astype(qkv_vmem.dtype)

    # ---- self-attention ----
    scale = 1.0 / math.sqrt(dh)
    m = mask_ref[...]                                                # (1, S) additive mask
    # TODO(synk): at real dims (nH=12, dh=64) replace this static unroll with a
    # lax.fori_loop over head PAIRS so MXU operands/stores are 128-lane aligned.
    for h in range(nH):
        q = qkv_vmem[:, pl.ds(h * dh, dh)]                           # (S, dh) bf16
        k = qkv_vmem[:, pl.ds(H + h * dh, dh)]
        v = qkv_vmem[:, pl.ds(2 * H + h * dh, dh)]
        s = _mm_t(q, k) * scale + m                                  # (S, S) f32
        mx = jnp.max(s, axis=-1, keepdims=True)
        e = jnp.exp(s - mx)
        p = e * pl.reciprocal(jnp.sum(e, axis=-1, keepdims=True), approx=True)
        ctx_vmem[:, pl.ds(h * dh, dh)] = _mm(p, v).astype(ctx_vmem.dtype)

    # ---- attention output projection + add & LayerNorm ----
    attn = _mm(ctx_vmem[...], wo_ref[...]) + bo_ref[...]
    x1 = _layernorm(attn + x, ln1g_ref[...], ln1b_ref[...], eps)

    # ---- feed-forward (GELU) + add & LayerNorm ----
    h1 = _gelu(_mm(x1, wi_ref[...]) + bi_ref[...])
    h2 = _mm(h1, wo2_ref[...]) + bo2_ref[...]
    x2 = _layernorm(h2 + x1, ln2g_ref[...], ln2b_ref[...], eps)
    x_vmem[...] = x2

    # ---- last layer: fused pooler + dropout(identity) + classifier head ----
    @pl.when(layer == pl.num_programs(1) - 1)
    def _():
        cls = x2[0:1, :]                                             # CLS row, (1, H)
        pooled = jnp.tanh(_mm(cls, pw_ref[...]) + pb_ref[...])
        # TODO(synk): nn.Dropout implemented as identity (eval-mode semantics).
        logits = _mm(pooled, fw_ref[...]) + fb_ref[...]              # (1, 128) lane-dense
        o_ref[...] = jnp.broadcast_to(logits, o_ref.shape).astype(o_ref.dtype)


# ---------------------------------------------------------------------------
# Pallas wrapper: whole model (encoder stack + pooler + head) in ONE pallas_call
# ---------------------------------------------------------------------------
def pallas_bert(emb, mask, p, *, nH, eps=1e-12):
    B, S, H = emb.shape
    L = p["wqkv"].shape[0]
    I = p["wi"].shape[-1]
    dh = H // nH
    kernel = functools.partial(encoder_kernel, nH=nH, dh=dh, eps=eps)

    def per_layer(r, c):      # (L, r, c) stacked params; layer dim squeezed
        return pl.BlockSpec((None, r, c), lambda b, l: (l, 0, 0))

    def per_batch(r, c):      # (B, r, c) inputs/outputs; batch dim squeezed
        return pl.BlockSpec((None, r, c), lambda b, l: (b, 0, 0))

    def resident(r, c):       # whole-array 2-D block, resident across the grid
        return pl.BlockSpec((r, c), lambda b, l: (0, 0))

    grid_spec = pltpu.PrefetchScalarGridSpec(
        num_scalar_prefetch=0,
        grid=(B, L),                                     # batch (parallel), layer (seq)
        in_specs=[
            per_batch(S, H),                             # embeddings
            per_batch(1, S),                             # additive attention mask
            resident(1, H), resident(1, H),              # embedding LN gamma/beta
            per_layer(H, 3 * H), per_layer(1, 3 * H),    # fused wqkv (bf16), bqkv
            per_layer(H, H), per_layer(1, H),            # wo (bf16), bo
            per_layer(1, H), per_layer(1, H),            # ln1 gamma/beta
            per_layer(H, I), per_layer(1, I),            # wi (bf16), bi
            per_layer(I, H), per_layer(1, H),            # wo2 (bf16), bo2
            per_layer(1, H), per_layer(1, H),            # ln2 gamma/beta
            resident(H, H), resident(1, H),              # pooler weight (bf16) / bias
            resident(H, NPAD), resident(1, NPAD),        # padded fc weight (bf16) / bias
        ],
        out_specs=pl.BlockSpec((None, SUB, NPAD), lambda b, l: (b, 0, 0)),
        scratch_shapes=[
            pltpu.VMEM((S, H), jnp.float32),             # running activation (f32)
            pltpu.VMEM((S, 3 * H), jnp.bfloat16),        # fused qkv (MXU-only -> bf16)
            pltpu.VMEM((S, H), jnp.bfloat16),            # attention context (bf16)
        ],
    )
    return pl.pallas_call(
        kernel,
        out_shape=jax.ShapeDtypeStruct((B, SUB, NPAD), jnp.float32),
        grid_spec=grid_spec,
        compiler_params=pltpu.CompilerParams(
            # batches independent (v7x 2nd TC), layers sequential over resident scratch
            dimension_semantics=("parallel", "arbitrary"),
            # above v5e/v6e scoped defaults, with headroom under v7x's 64 MiB physical
            vmem_limit_bytes=48 * 1024 * 1024),
    )(emb, mask,
      p["emb_ln_g"], p["emb_ln_b"],
      p["wqkv"], p["bqkv"], p["wo"], p["bo"], p["ln1g"], p["ln1b"],
      p["wi"], p["bi"], p["wo2"], p["bo2"], p["ln2g"], p["ln2b"],
      p["pool_w"], p["pool_b"], p["fc_w"], p["fc_b"])


# ---------------------------------------------------------------------------
# Parameter initialization (deterministic, synthetic BERT)
# ---------------------------------------------------------------------------
CFG = dict(
    vocab_size=50, type_vocab_size=2, max_position=16,
    hidden=32, n_heads=2, n_layers=2, intermediate=64, n_class=3,
)


def _lin(key, fan_in, fan_out):
    kw, kb = jax.random.split(key)
    w = 0.02 * jax.random.normal(kw, (fan_in, fan_out), jnp.float32)
    b = 0.02 * jax.random.normal(kb, (fan_out,), jnp.float32)
    return w, b


def init_params(key, cfg):
    H, I = cfg["hidden"], cfg["intermediate"]
    keys = jax.random.split(key, 8 + 8 * cfg["n_layers"])
    ki = iter(keys)
    p = {
        "word_emb": 0.02 * jax.random.normal(next(ki), (cfg["vocab_size"], H), jnp.float32),
        "pos_emb": 0.02 * jax.random.normal(next(ki), (cfg["max_position"], H), jnp.float32),
        "type_emb": 0.02 * jax.random.normal(next(ki), (cfg["type_vocab_size"], H), jnp.float32),
        "emb_ln_g": jnp.ones((H,), jnp.float32),
        "emb_ln_b": jnp.zeros((H,), jnp.float32),
        "layers": [],
    }
    for _ in range(cfg["n_layers"]):
        wq, bq = _lin(next(ki), H, H)
        wk, bk = _lin(next(ki), H, H)
        wv, bv = _lin(next(ki), H, H)
        wo, bo = _lin(next(ki), H, H)
        wi, bi = _lin(next(ki), H, I)
        wo2, bo2 = _lin(next(ki), I, H)
        p["layers"].append(dict(
            wq=wq, bq=bq, wk=wk, bk=bk, wv=wv, bv=bv, wo=wo, bo=bo,
            ln1_g=jnp.ones((H,), jnp.float32), ln1_b=jnp.zeros((H,), jnp.float32),
            wi=wi, bi=bi, wo2=wo2, bo2=bo2,
            ln2_g=jnp.ones((H,), jnp.float32), ln2_b=jnp.zeros((H,), jnp.float32),
        ))
    p["pool_w"], p["pool_b"] = _lin(next(ki), H, H)
    p["fc_w"], p["fc_b"] = _lin(next(ki), H, cfg["n_class"])
    return p


# ---------------------------------------------------------------------------
# One-time parameter packing: stack layers, fuse QKV, cast MXU weights to bf16,
# pad classifier head to 128 lanes.  Done ONCE, outside the steady-state forward.
# ---------------------------------------------------------------------------
def prepare_params(params, cfg):
    H = cfg["hidden"]
    n_class = cfg["n_class"]
    layers = params["layers"]
    bf16 = lambda w: w.astype(jnp.bfloat16)
    return dict(
        word_emb=params["word_emb"], pos_emb=params["pos_emb"], type_emb=params["type_emb"],
        emb_ln_g=params["emb_ln_g"].reshape(1, H),
        emb_ln_b=params["emb_ln_b"].reshape(1, H),
        wqkv=bf16(jnp.stack([jnp.concatenate([lp["wq"], lp["wk"], lp["wv"]], axis=1)
                             for lp in layers])),                         # (L, H, 3H) bf16
        bqkv=jnp.stack([jnp.concatenate([lp["bq"], lp["bk"], lp["bv"]])[None, :]
                        for lp in layers]),                               # (L, 1, 3H) f32
        wo=bf16(jnp.stack([lp["wo"] for lp in layers])),
        bo=jnp.stack([lp["bo"][None, :] for lp in layers]),
        ln1g=jnp.stack([lp["ln1_g"][None, :] for lp in layers]),
        ln1b=jnp.stack([lp["ln1_b"][None, :] for lp in layers]),
        wi=bf16(jnp.stack([lp["wi"] for lp in layers])),
        bi=jnp.stack([lp["bi"][None, :] for lp in layers]),
        wo2=bf16(jnp.stack([lp["wo2"] for lp in layers])),
        bo2=jnp.stack([lp["bo2"][None, :] for lp in layers]),
        ln2g=jnp.stack([lp["ln2_g"][None, :] for lp in layers]),
        ln2b=jnp.stack([lp["ln2_b"][None, :] for lp in layers]),
        pool_w=bf16(params["pool_w"]),
        pool_b=params["pool_b"].reshape(1, H),
        fc_w=bf16(jnp.pad(params["fc_w"], ((0, 0), (0, NPAD - n_class)))),
        fc_b=jnp.pad(params["fc_b"], (0, NPAD - n_class)).reshape(1, NPAD),
    )


# ---------------------------------------------------------------------------
# Forward pass (embedding gathers in JAX glue; everything else in one Pallas kernel)
# ---------------------------------------------------------------------------
def bert_classifier_forward(packed, input_ids, attention_mask, token_type_ids, cfg):
    B, S = input_ids.shape
    H, nH = cfg["hidden"], cfg["n_heads"]
    n_class = cfg["n_class"]

    # ---- embeddings (gathers = glue) ----
    pos_ids = jnp.arange(S)
    emb = (jnp.take(packed["word_emb"], input_ids, axis=0)
           + jnp.take(packed["pos_emb"], pos_ids, axis=0)[None, :, :]
           + jnp.take(packed["type_emb"], token_type_ids, axis=0))          # (B, S, H)

    # additive attention mask, compact (B, 1, S); broadcast per-batch inside the kernel
    add_mask = ((1.0 - attention_mask.astype(jnp.float32)) * -10000.0).reshape(B, 1, S)

    # ---- encoder stack + pooler + classifier head: ONE pallas_call ----
    logits_pad = pallas_bert(emb, add_mask, packed, nH=nH)                  # (B, 8, 128)
    return logits_pad[:, 0, :n_class]


# ---------------------------------------------------------------------------
if __name__ == "__main__":
    key = jax.random.PRNGKey(0)
    kp, ki, km, kt = jax.random.split(key, 4)

    params = init_params(kp, CFG)
    packed = prepare_params(params, CFG)   # one-time weight packing / bf16 cast

    B, S = 2, 8
    input_ids = jax.random.randint(ki, (B, S), 0, CFG["vocab_size"], dtype=jnp.int32)
    attention_mask = jnp.concatenate(
        [jnp.ones((B, S - 2), jnp.int32), jnp.zeros((B, 2), jnp.int32)], axis=1)
    token_type_ids = jnp.concatenate(
        [jnp.zeros((B, S // 2), jnp.int32), jnp.ones((B, S // 2), jnp.int32)], axis=1)

    logits = bert_classifier_forward(packed, input_ids, attention_mask,
                                     token_type_ids, CFG)
    logits = jax.block_until_ready(logits)
    assert logits.shape == (B, CFG["n_class"])
    assert bool(jnp.all(jnp.isfinite(logits)))
    print("KERNEL_OK")
</pallas_src>

<mosaic_0001>
module attributes {stable_mosaic.version = 11 : i64} {
  func.func @encoder_kernel(%arg0: i32, %arg1: i32, %arg2: memref<1x8x32xf32, #tpu.memory_space<vmem>>, %arg3: memref<1x1x8xf32, #tpu.memory_space<vmem>>, %arg4: memref<1x32xf32, #tpu.memory_space<vmem>>, %arg5: memref<1x32xf32, #tpu.memory_space<vmem>>, %arg6: memref<1x32x96xbf16, #tpu.memory_space<vmem>>, %arg7: memref<1x1x96xf32, #tpu.memory_space<vmem>>, %arg8: memref<1x32x32xbf16, #tpu.memory_space<vmem>>, %arg9: memref<1x1x32xf32, #tpu.memory_space<vmem>>, %arg10: memref<1x1x32xf32, #tpu.memory_space<vmem>>, %arg11: memref<1x1x32xf32, #tpu.memory_space<vmem>>, %arg12: memref<1x32x64xbf16, #tpu.memory_space<vmem>>, %arg13: memref<1x1x64xf32, #tpu.memory_space<vmem>>, %arg14: memref<1x64x32xbf16, #tpu.memory_space<vmem>>, %arg15: memref<1x1x32xf32, #tpu.memory_space<vmem>>, %arg16: memref<1x1x32xf32, #tpu.memory_space<vmem>>, %arg17: memref<1x1x32xf32, #tpu.memory_space<vmem>>, %arg18: memref<32x32xbf16, #tpu.memory_space<vmem>>, %arg19: memref<1x32xf32, #tpu.memory_space<vmem>>, %arg20: memref<32x128xbf16, #tpu.memory_space<vmem>>, %arg21: memref<1x128xf32, #tpu.memory_space<vmem>>, %arg22: memref<1x8x128xf32, #tpu.memory_space<vmem>>, %arg23: memref<8x32xf32, #tpu.memory_space<vmem>>, %arg24: memref<8x96xbf16, #tpu.memory_space<vmem>>, %arg25: memref<8x32xbf16, #tpu.memory_space<vmem>>) attributes {dimension_semantics = [#tpu.dimension_semantics<parallel>, #tpu.dimension_semantics<arbitrary>], iteration_bounds = array<i64: 2, 2>, scalar_prefetch = 0 : i64, scratch_operands = 3 : i64, tpu.core_type = #tpu.core_type<tc>, window_params = [{transform_indices = @transform_0, window_bounds = array<i64: 1, 8, 32>}, {transform_indices = @transform_1, window_bounds = array<i64: 1, 1, 8>}, {pipeline_mode = #tpu.pipeline_mode<synchronous>, transform_indices = @transform_2, window_bounds = array<i64: 1, 32>}, {pipeline_mode = #tpu.pipeline_mode<synchronous>, transform_indices = @transform_3, window_bounds = array<i64: 1, 32>}, {transform_indices = @transform_4, window_bounds = array<i64: 1, 32, 96>}, {transform_indices = @transform_5, window_bounds = array<i64: 1, 1, 96>}, {transform_indices = @transform_6, window_bounds = array<i64: 1, 32, 32>}, {transform_indices = @transform_7, window_bounds = array<i64: 1, 1, 32>}, {transform_indices = @transform_8, window_bounds = array<i64: 1, 1, 32>}, {transform_indices = @transform_9, window_bounds = array<i64: 1, 1, 32>}, {transform_indices = @transform_10, window_bounds = array<i64: 1, 32, 64>}, {transform_indices = @transform_11, window_bounds = array<i64: 1, 1, 64>}, {transform_indices = @transform_12, window_bounds = array<i64: 1, 64, 32>}, {transform_indices = @transform_13, window_bounds = array<i64: 1, 1, 32>}, {transform_indices = @transform_14, window_bounds = array<i64: 1, 1, 32>}, {transform_indices = @transform_15, window_bounds = array<i64: 1, 1, 32>}, {pipeline_mode = #tpu.pipeline_mode<synchronous>, transform_indices = @transform_16, window_bounds = array<i64: 32, 32>}, {pipeline_mode = #tpu.pipeline_mode<synchronous>, transform_indices = @transform_17, window_bounds = array<i64: 1, 32>}, {pipeline_mode = #tpu.pipeline_mode<synchronous>, transform_indices = @transform_18, window_bounds = array<i64: 32, 128>}, {pipeline_mode = #tpu.pipeline_mode<synchronous>, transform_indices = @transform_19, window_bounds = array<i64: 1, 128>}, {transform_indices = @transform_20, window_bounds = array<i64: 1, 8, 128>}]} {
    %c0_i32 = arith.constant 0 : i32
    %0 = arith.cmpi eq, %arg1, %c0_i32 : i32
    %1 = arith.extui %0 : i1 to i32
    %c0_i32_0 = arith.constant 0 : i32
    %2 = arith.cmpi ne, %1, %c0_i32_0 : i32
    scf.if %2 {
      %c0_86 = arith.constant 0 : index
      %c0_87 = arith.constant 0 : index
      %c0_88 = arith.constant 0 : index
      %159 = vector.load %arg2[%c0_86, %c0_87, %c0_88] : memref<1x8x32xf32, #tpu.memory_space<vmem>>, vector<1x8x32xf32>
      %160 = vector.shape_cast %159 : vector<1x8x32xf32> to vector<8x32xf32>
      %c0_89 = arith.constant 0 : index
      %c0_90 = arith.constant 0 : index
      %161 = vector.load %arg4[%c0_89, %c0_90] : memref<1x32xf32, #tpu.memory_space<vmem>>, vector<1x32xf32>
      %c0_91 = arith.constant 0 : index
      %c0_92 = arith.constant 0 : index
      %162 = vector.load %arg5[%c0_91, %c0_92] : memref<1x32xf32, #tpu.memory_space<vmem>>, vector<1x32xf32>
      %cst_93 = arith.constant dense<0.000000e+00> : vector<8xf32>
      %163 = vector.multi_reduction <add>, %160, %cst_93 [1] : vector<8x32xf32> to vector<8xf32>
      %164 = vector.shape_cast %163 : vector<8xf32> to vector<8x1xf32>
      %cst_94 = arith.constant 3.200000e+01 : f32
      %165 = vector.broadcast %cst_94 : f32 to vector<8x1xf32>
      %166 = arith.divf %164, %165 : vector<8x1xf32>
      %167 = vector.broadcast %166 : vector<8x1xf32> to vector<8x32xf32>
      %168 = arith.subf %160, %167 : vector<8x32xf32>
      %169 = vector.broadcast %166 : vector<8x1xf32> to vector<8x32xf32>
      %170 = arith.subf %160, %169 : vector<8x32xf32>
      %171 = arith.mulf %168, %170 : vector<8x32xf32>
      %cst_95 = arith.constant dense<0.000000e+00> : vector<8xf32>
      %172 = vector.multi_reduction <add>, %171, %cst_95 [1] : vector<8x32xf32> to vector<8xf32>
      %173 = vector.shape_cast %172 : vector<8xf32> to vector<8x1xf32>
      %cst_96 = arith.constant 3.200000e+01 : f32
      %174 = vector.broadcast %cst_96 : f32 to vector<8x1xf32>
      %175 = arith.divf %173, %174 : vector<8x1xf32>
      %176 = vector.broadcast %166 : vector<8x1xf32> to vector<8x32xf32>
      %177 = arith.subf %160, %176 : vector<8x32xf32>
      %cst_97 = arith.constant 9.99999996E-13 : f32
      %178 = vector.broadcast %cst_97 : f32 to vector<8x1xf32>
      %179 = arith.addf %175, %178 : vector<8x1xf32>
      %180 = math.rsqrt %179 : vector<8x1xf32>
      %181 = vector.broadcast %180 : vector<8x1xf32> to vector<8x32xf32>
      %182 = arith.mulf %177, %181 : vector<8x32xf32>
      %183 = vector.broadcast %161 : vector<1x32xf32> to vector<8x32xf32>
      %184 = arith.mulf %182, %183 : vector<8x32xf32>
      %185 = vector.broadcast %162 : vector<1x32xf32> to vector<8x32xf32>
      %186 = arith.addf %184, %185 : vector<8x32xf32>
      %c0_98 = arith.constant 0 : index
      %c0_99 = arith.constant 0 : index
      %187 = vector.load %arg23[%c0_98, %c0_99] : memref<8x32xf32, #tpu.memory_space<vmem>>, vector<8x32xf32>
      tpu.vector_store %arg23[%c0_98, %c0_99], %186 {strides = array<i32>} : memref<8x32xf32, #tpu.memory_space<vmem>>, vector<8x32xf32>,
    } else {
    }
    %c0 = arith.constant 0 : index
    %c0_1 = arith.constant 0 : index
    %3 = vector.load %arg23[%c0, %c0_1] : memref<8x32xf32, #tpu.memory_space<vmem>>, vector<8x32xf32>
    %c0_2 = arith.constant 0 : index
    %c0_3 = arith.constant 0 : index
    %c0_4 = arith.constant 0 : index
    %4 = vector.load %arg6[%c0_2, %c0_3, %c0_4] : memref<1x32x96xbf16, #tpu.memory_space<vmem>>, vector<1x32x96xbf16>
    %5 = vector.shape_cast %4 : vector<1x32x96xbf16> to vector<32x96xbf16>
    %6 = arith.truncf %3 : vector<8x32xf32> to vector<8x32xbf16>
    %cst = arith.constant dense<0.000000e+00> : vector<8x96xf32>
    %7 = tpu.matmul %6, %5, %cst {dimension_numbers = #tpu.dot_dimension_numbers<[1], [0], [0], [1], [0, 0, 1, 1], [], []>} : vector<8x32xbf16>, vector<32x96xbf16>, vector<8x96xf32> -> vector<8x96xf32>
    %c0_5 = arith.constant 0 : index
    %c0_6 = arith.constant 0 : index
    %c0_7 = arith.constant 0 : index
    %8 = vector.load %arg7[%c0_5, %c0_6, %c0_7] : memref<1x1x96xf32, #tpu.memory_space<vmem>>, vector<1x1x96xf32>
    %9 = vector.shape_cast %8 : vector<1x1x96xf32> to vector<1x96xf32>
    %10 = vector.broadcast %9 : vector<1x96xf32> to vector<8x96xf32>
    %11 = arith.addf %7, %10 : vector<8x96xf32>
    %12 = arith.truncf %11 : vector<8x96xf32> to vector<8x96xbf16>
    %c0_8 = arith.constant 0 : index
    %c0_9 = arith.constant 0 : index
    %13 = vector.load %arg24[%c0_8, %c0_9] : memref<8x96xbf16, #tpu.memory_space<vmem>>, vector<8x96xbf16>
    tpu.vector_store %arg24[%c0_8, %c0_9], %12 {strides = array<i32>} : memref<8x96xbf16, #tpu.memory_space<vmem>>, vector<8x96xbf16>,
    %c0_10 = arith.constant 0 : index
    %c0_11 = arith.constant 0 : index
    %c0_12 = arith.constant 0 : index
    %14 = vector.load %arg3[%c0_10, %c0_11, %c0_12] : memref<1x1x8xf32, #tpu.memory_space<vmem>>, vector<1x1x8xf32>
    %15 = vector.shape_cast %14 : vector<1x1x8xf32> to vector<1x8xf32>
    %c0_13 = arith.constant 0 : index
    %c0_14 = arith.constant 0 : index
    %16 = vector.load %arg24[%c0_13, %c0_14] : memref<8x96xbf16, #tpu.memory_space<vmem>>, vector<8x16xbf16>
    %c0_15 = arith.constant 0 : index
    %c32 = arith.constant 32 : index
    %17 = vector.load %arg24[%c0_15, %c32] : memref<8x96xbf16, #tpu.memory_space<vmem>>, vector<8x16xbf16>
    %c0_16 = arith.constant 0 : index
    %c64 = arith.constant 64 : index
    %18 = vector.load %arg24[%c0_16, %c64] : memref<8x96xbf16, #tpu.memory_space<vmem>>, vector<8x16xbf16>
    %cst_17 = arith.constant dense<0.000000e+00> : vector<8x8xf32>
    %19 = tpu.matmul %16, %17, %cst_17 {dimension_numbers = #tpu.dot_dimension_numbers<[1], [1], [0], [0], [0, 0, 1, 0], [], []>} : vector<8x16xbf16>, vector<8x16xbf16>, vector<8x8xf32> -> vector<8x8xf32>
    %cst_18 = arith.constant 2.500000e-01 : f32
    %20 = vector.broadcast %cst_18 : f32 to vector<8x8xf32>
    %21 = arith.mulf %19, %20 : vector<8x8xf32>
    %22 = vector.broadcast %15 : vector<1x8xf32> to vector<8x8xf32>
    %23 = arith.addf %21, %22 : vector<8x8xf32>
    %cst_19 = arith.constant dense<0xFF800000> : vector<8xf32>
    %24 = vector.multi_reduction <maximumf>, %23, %cst_19 [1] : vector<8x8xf32> to vector<8xf32>
    %25 = vector.shape_cast %24 : vector<8xf32> to vector<8x1xf32>
    %26 = vector.broadcast %25 : vector<8x1xf32> to vector<8x8xf32>
    %27 = arith.subf %23, %26 : vector<8x8xf32>
    %28 = math.exp %27 : vector<8x8xf32>
    %cst_20 = arith.constant dense<0.000000e+00> : vector<8xf32>
    %29 = vector.multi_reduction <add>, %28, %cst_20 [1] : vector<8x8xf32> to vector<8xf32>
    %30 = vector.shape_cast %29 : vector<8xf32> to vector<8x1xf32>
    %31 = tpu.reciprocal %30 {approx = true} : vector<8x1xf32> -> vector<8x1xf32>
    %32 = vector.broadcast %31 : vector<8x1xf32> to vector<8x8xf32>
    %33 = arith.mulf %28, %32 : vector<8x8xf32>
    %34 = arith.truncf %33 : vector<8x8xf32> to vector<8x8xbf16>
    %cst_21 = arith.constant dense<0.000000e+00> : vector<8x16xf32>
    %35 = tpu.matmul %34, %18, %cst_21 {dimension_numbers = #tpu.dot_dimension_numbers<[1], [0], [0], [1], [0, 0, 1, 1], [], []>} : vector<8x8xbf16>, vector<8x16xbf16>, vector<8x16xf32> -> vector<8x16xf32>
    %36 = arith.truncf %35 : vector<8x16xf32> to vector<8x16xbf16>
    %c0_22 = arith.constant 0 : index
    %c0_23 = arith.constant 0 : index
    %37 = vector.load %arg25[%c0_22, %c0_23] : memref<8x32xbf16, #tpu.memory_space<vmem>>, vector<8x16xbf16>
    tpu.vector_store %arg25[%c0_22, %c0_23], %36 {strides = array<i32>} : memref<8x32xbf16, #tpu.memory_space<vmem>>, vector<8x16xbf16>,
    %c0_24 = arith.constant 0 : index
    %c16 = arith.constant 16 : index
    %38 = vector.load %arg24[%c0_24, %c16] : memref<8x96xbf16, #tpu.memory_space<vmem>>, vector<8x16xbf16>
    %c0_25 = arith.constant 0 : index
    %c48 = arith.constant 48 : index
    %39 = vector.load %arg24[%c0_25, %c48] : memref<8x96xbf16, #tpu.memory_space<vmem>>, vector<8x16xbf16>
    %c0_26 = arith.constant 0 : index
    %c80 = arith.constant 80 : index
    %40 = vector.load %arg24[%c0_26, %c80] : memref<8x96xbf16, #tpu.memory_space<vmem>>, vector<8x16xbf16>
    %cst_27 = arith.constant dense<0.000000e+00> : vector<8x8xf32>
    %41 = tpu.matmul %38, %39, %cst_27 {dimension_numbers = #tpu.dot_dimension_numbers<[1], [1], [0], [0], [0, 0, 1, 0], [], []>} : vector<8x16xbf16>, vector<8x16xbf16>, vector<8x8xf32> -> vector<8x8xf32>
    %cst_28 = arith.constant 2.500000e-01 : f32
    %42 = vector.broadcast %cst_28 : f32 to vector<8x8xf32>
    %43 = arith.mulf %41, %42 : vector<8x8xf32>
    %44 = vector.broadcast %15 : vector<1x8xf32> to vector<8x8xf32>
    %45 = arith.addf %43, %44 : vector<8x8xf32>
    %cst_29 = arith.constant dense<0xFF800000> : vector<8xf32>
    %46 = vector.multi_reduction <maximumf>, %45, %cst_29 [1] : vector<8x8xf32> to vector<8xf32>
    %47 = vector.shape_cast %46 : vector<8xf32> to vector<8x1xf32>
    %48 = vector.broadcast %47 : vector<8x1xf32> to vector<8x8xf32>
    %49 = arith.subf %45, %48 : vector<8x8xf32>
    %50 = math.exp %49 : vector<8x8xf32>
    %cst_30 = arith.constant dense<0.000000e+00> : vector<8xf32>
    %51 = vector.multi_reduction <add>, %50, %cst_30 [1] : vector<8x8xf32> to vector<8xf32>
    %52 = vector.shape_cast %51 : vector<8xf32> to vector<8x1xf32>
    %53 = tpu.reciprocal %52 {approx = true} : vector<8x1xf32> -> vector<8x1xf32>
    %54 = vector.broadcast %53 : vector<8x1xf32> to vector<8x8xf32>
    %55 = arith.mulf %50, %54 : vector<8x8xf32>
    %56 = arith.truncf %55 : vector<8x8xf32> to vector<8x8xbf16>
    %cst_31 = arith.constant dense<0.000000e+00> : vector<8x16xf32>
    %57 = tpu.matmul %56, %40, %cst_31 {dimension_numbers = #tpu.dot_dimension_numbers<[1], [0], [0], [1], [0, 0, 1, 1], [], []>} : vector<8x8xbf16>, vector<8x16xbf16>, vector<8x16xf32> -> vector<8x16xf32>
    %58 = arith.truncf %57 : vector<8x16xf32> to vector<8x16xbf16>
    %c0_32 = arith.constant 0 : index
    %c16_33 = arith.constant 16 : index
    %59 = vector.load %arg25[%c0_32, %c16_33] : memref<8x32xbf16, #tpu.memory_space<vmem>>, vector<8x16xbf16>
    tpu.vector_store %arg25[%c0_32, %c16_33], %58 {strides = array<i32>} : memref<8x32xbf16, #tpu.memory_space<vmem>>, vector<8x16xbf16>,
    %c0_34 = arith.constant 0 : index
    %c0_35 = arith.constant 0 : index
    %60 = vector.load %arg25[%c0_34, %c0_35] : memref<8x32xbf16, #tpu.memory_space<vmem>>, vector<8x32xbf16>
    %c0_36 = arith.constant 0 : index
    %c0_37 = arith.constant 0 : index
    %c0_38 = arith.constant 0 : index
    %61 = vector.load %arg8[%c0_36, %c0_37, %c0_38] : memref<1x32x32xbf16, #tpu.memory_space<vmem>>, vector<1x32x32xbf16>
    %62 = vector.shape_cast %61 : vector<1x32x32xbf16> to vector<32x32xbf16>
    %cst_39 = arith.constant dense<0.000000e+00> : vector<8x32xf32>
    %63 = tpu.matmul %60, %62, %cst_39 {dimension_numbers = #tpu.dot_dimension_numbers<[1], [0], [0], [1], [0, 0, 1, 1], [], []>} : vector<8x32xbf16>, vector<32x32xbf16>, vector<8x32xf32> -> vector<8x32xf32>
    %c0_40 = arith.constant 0 : index
    %c0_41 = arith.constant 0 : index
    %c0_42 = arith.constant 0 : index
    %64 = vector.load %arg9[%c0_40, %c0_41, %c0_42] : memref<1x1x32xf32, #tpu.memory_space<vmem>>, vector<1x1x32xf32>
    %65 = vector.shape_cast %64 : vector<1x1x32xf32> to vector<1x32xf32>
    %66 = vector.broadcast %65 : vector<1x32xf32> to vector<8x32xf32>
    %67 = arith.addf %63, %66 : vector<8x32xf32>
    %68 = arith.addf %67, %3 : vector<8x32xf32>
    %c0_43 = arith.constant 0 : index
    %c0_44 = arith.constant 0 : index
    %c0_45 = arith.constant 0 : index
    %69 = vector.load %arg10[%c0_43, %c0_44, %c0_45] : memref<1x1x32xf32, #tpu.memory_space<vmem>>, vector<1x1x32xf32>
    %70 = vector.shape_cast %69 : vector<1x1x32xf32> to vector<1x32xf32>
    %c0_46 = arith.constant 0 : index
    %c0_47 = arith.constant 0 : index
    %c0_48 = arith.constant 0 : index
    %71 = vector.load %arg11[%c0_46, %c0_47, %c0_48] : memref<1x1x32xf32, #tpu.memory_space<vmem>>, vector<1x1x32xf32>
    %72 = vector.shape_cast %71 : vector<1x1x32xf32> to vector<1x32xf32>
    %cst_49 = arith.constant dense<0.000000e+00> : vector<8xf32>
    %73 = vector.multi_reduction <add>, %68, %cst_49 [1] : vector<8x32xf32> to vector<8xf32>
    %74 = vector.shape_cast %73 : vector<8xf32> to vector<8x1xf32>
    %cst_50 = arith.constant 3.200000e+01 : f32
    %75 = vector.broadcast %cst_50 : f32 to vector<8x1xf32>
    %76 = arith.divf %74, %75 : vector<8x1xf32>
    %77 = vector.broadcast %76 : vector<8x1xf32> to vector<8x32xf32>
    %78 = arith.subf %68, %77 : vector<8x32xf32>
    %79 = vector.broadcast %76 : vector<8x1xf32> to vector<8x32xf32>
    %80 = arith.subf %68, %79 : vector<8x32xf32>
    %81 = arith.mulf %78, %80 : vector<8x32xf32>
    %cst_51 = arith.constant dense<0.000000e+00> : vector<8xf32>
    %82 = vector.multi_reduction <add>, %81, %cst_51 [1] : vector<8x32xf32> to vector<8xf32>
    %83 = vector.shape_cast %82 : vector<8xf32> to vector<8x1xf32>
    %cst_52 = arith.constant 3.200000e+01 : f32
    %84 = vector.broadcast %cst_52 : f32 to vector<8x1xf32>
    %85 = arith.divf %83, %84 : vector<8x1xf32>
    %86 = vector.broadcast %76 : vector<8x1xf32> to vector<8x32xf32>
    %87 = arith.subf %68, %86 : vector<8x32xf32>
    %cst_53 = arith.constant 9.99999996E-13 : f32
    %88 = vector.broadcast %cst_53 : f32 to vector<8x1xf32>
    %89 = arith.addf %85, %88 : vector<8x1xf32>
    %90 = math.rsqrt %89 : vector<8x1xf32>
    %91 = vector.broadcast %90 : vector<8x1xf32> to vector<8x32xf32>
    %92 = arith.mulf %87, %91 : vector<8x32xf32>
    %93 = vector.broadcast %70 : vector<1x32xf32> to vector<8x32xf32>
    %94 = arith.mulf %92, %93 : vector<8x32xf32>
    %95 = vector.broadcast %72 : vector<1x32xf32> to vector<8x32xf32>
    %96 = arith.addf %94, %95 : vector<8x32xf32>
    %c0_54 = arith.constant 0 : index
    %c0_55 = arith.constant 0 : index
    %c0_56 = arith.constant 0 : index
    %97 = vector.load %arg12[%c0_54, %c0_55, %c0_56] : memref<1x32x64xbf16, #tpu.memory_space<vmem>>, vector<1x32x64xbf16>
    %98 = vector.shape_cast %97 : vector<1x32x64xbf16> to vector<32x64xbf16>
    %99 = arith.truncf %96 : vector<8x32xf32> to vector<8x32xbf16>
    %cst_57 = arith.constant dense<0.000000e+00> : vector<8x64xf32>
    %100 = tpu.matmul %99, %98, %cst_57 {dimension_numbers = #tpu.dot_dimension_numbers<[1], [0], [0], [1], [0, 0, 1, 1], [], []>} : vector<8x32xbf16>, vector<32x64xbf16>, vector<8x64xf32> -> vector<8x64xf32>
    %c0_58 = arith.constant 0 : index
    %c0_59 = arith.constant 0 : index
    %c0_60 = arith.constant 0 : index
    %101 = vector.load %arg13[%c0_58, %c0_59, %c0_60] : memref<1x1x64xf32, #tpu.memory_space<vmem>>, vector<1x1x64xf32>
    %102 = vector.shape_cast %101 : vector<1x1x64xf32> to vector<1x64xf32>
    %103 = vector.broadcast %102 : vector<1x64xf32> to vector<8x64xf32>
    %104 = arith.addf %100, %103 : vector<8x64xf32>
    %cst_61 = arith.constant 5.000000e-01 : f32
    %105 = vector.broadcast %cst_61 : f32 to vector<8x64xf32>
    %106 = arith.mulf %105, %104 : vector<8x64xf32>
    %cst_62 = arith.constant 4.471500e-02 : f32
    %107 = vector.broadcast %cst_62 : f32 to vector<8x64xf32>
    %108 = arith.mulf %107, %104 : vector<8x64xf32>
    %109 = arith.mulf %108, %104 : vector<8x64xf32>
    %110 = arith.mulf %109, %104 : vector<8x64xf32>
    %111 = arith.addf %104, %110 : vector<8x64xf32>
    %cst_63 = arith.constant 0.797884583 : f32
    %112 = vector.broadcast %cst_63 : f32 to vector<8x64xf32>
    %113 = arith.mulf %112, %111 : vector<8x64xf32>
    %114 = math.tanh %113 : vector<8x64xf32>
    %cst_64 = arith.constant 1.000000e+00 : f32
    %115 = vector.broadcast %cst_64 : f32 to vector<8x64xf32>
    %116 = arith.addf %115, %114 : vector<8x64xf32>
    %117 = arith.mulf %106, %116 : vector<8x64xf32>
    %c0_65 = arith.constant 0 : index
    %c0_66 = arith.constant 0 : index
    %c0_67 = arith.constant 0 : index
    %118 = vector.load %arg14[%c0_65, %c0_66, %c0_67] : memref<1x64x32xbf16, #tpu.memory_space<vmem>>, vector<1x64x32xbf16>
    %119 = vector.shape_cast %118 : vector<1x64x32xbf16> to vector<64x32xbf16>
    %120 = arith.truncf %117 : vector<8x64xf32> to vector<8x64xbf16>
    %cst_68 = arith.constant dense<0.000000e+00> : vector<8x32xf32>
    %121 = tpu.matmul %120, %119, %cst_68 {dimension_numbers = #tpu.dot_dimension_numbers<[1], [0], [0], [1], [0, 0, 1, 1], [], []>} : vector<8x64xbf16>, vector<64x32xbf16>, vector<8x32xf32> -> vector<8x32xf32>
    %c0_69 = arith.constant 0 : index
    %c0_70 = arith.constant 0 : index
    %c0_71 = arith.constant 0 : index
    %122 = vector.load %arg15[%c0_69, %c0_70, %c0_71] : memref<1x1x32xf32, #tpu.memory_space<vmem>>, vector<1x1x32xf32>
    %123 = vector.shape_cast %122 : vector<1x1x32xf32> to vector<1x32xf32>
    %124 = vector.broadcast %123 : vector<1x32xf32> to vector<8x32xf32>
    %125 = arith.addf %121, %124 : vector<8x32xf32>
    %126 = arith.addf %125, %96 : vector<8x32xf32>
    %c0_72 = arith.constant 0 : index
    %c0_73 = arith.constant 0 : index
    %c0_74 = arith.constant 0 : index
    %127 = vector.load %arg16[%c0_72, %c0_73, %c0_74] : memref<1x1x32xf32, #tpu.memory_space<vmem>>, vector<1x1x32xf32>
    %128 = vector.shape_cast %127 : vector<1x1x32xf32> to vector<1x32xf32>
    %c0_75 = arith.constant 0 : index
    %c0_76 = arith.constant 0 : index
    %c0_77 = arith.constant 0 : index
    %129 = vector.load %arg17[%c0_75, %c0_76, %c0_77] : memref<1x1x32xf32, #tpu.memory_space<vmem>>, vector<1x1x32xf32>
    %130 = vector.shape_cast %129 : vector<1x1x32xf32> to vector<1x32xf32>
    %cst_78 = arith.constant dense<0.000000e+00> : vector<8xf32>
    %131 = vector.multi_reduction <add>, %126, %cst_78 [1] : vector<8x32xf32> to vector<8xf32>
    %132 = vector.shape_cast %131 : vector<8xf32> to vector<8x1xf32>
    %cst_79 = arith.constant 3.200000e+01 : f32
    %133 = vector.broadcast %cst_79 : f32 to vector<8x1xf32>
    %134 = arith.divf %132, %133 : vector<8x1xf32>
    %135 = vector.broadcast %134 : vector<8x1xf32> to vector<8x32xf32>
    %136 = arith.subf %126, %135 : vector<8x32xf32>
    %137 = vector.broadcast %134 : vector<8x1xf32> to vector<8x32xf32>
    %138 = arith.subf %126, %137 : vector<8x32xf32>
    %139 = arith.mulf %136, %138 : vector<8x32xf32>
    %cst_80 = arith.constant dense<0.000000e+00> : vector<8xf32>
    %140 = vector.multi_reduction <add>, %139, %cst_80 [1] : vector<8x32xf32> to vector<8xf32>
    %141 = vector.shape_cast %140 : vector<8xf32> to vector<8x1xf32>
    %cst_81 = arith.constant 3.200000e+01 : f32
    %142 = vector.broadcast %cst_81 : f32 to vector<8x1xf32>
    %143 = arith.divf %141, %142 : vector<8x1xf32>
    %144 = vector.broadcast %134 : vector<8x1xf32> to vector<8x32xf32>
    %145 = arith.subf %126, %144 : vector<8x32xf32>
    %cst_82 = arith.constant 9.99999996E-13 : f32
    %146 = vector.broadcast %cst_82 : f32 to vector<8x1xf32>
    %147 = arith.addf %143, %146 : vector<8x1xf32>
    %148 = math.rsqrt %147 : vector<8x1xf32>
    %149 = vector.broadcast %148 : vector<8x1xf32> to vector<8x32xf32>
    %150 = arith.mulf %145, %149 : vector<8x32xf32>
    %151 = vector.broadcast %128 : vector<1x32xf32> to vector<8x32xf32>
    %152 = arith.mulf %150, %151 : vector<8x32xf32>
    %153 = vector.broadcast %130 : vector<1x32xf32> to vector<8x32xf32>
    %154 = arith.addf %152, %153 : vector<8x32xf32>
    %c0_83 = arith.constant 0 : index
    %c0_84 = arith.constant 0 : index
    %155 = vector.load %arg23[%c0_83, %c0_84] : memref<8x32xf32, #tpu.memory_space<vmem>>, vector<8x32xf32>
    tpu.vector_store %arg23[%c0_83, %c0_84], %154 {strides = array<i32>} : memref<8x32xf32, #tpu.memory_space<vmem>>, vector<8x32xf32>,
    %c1_i32 = arith.constant 1 : i32
    %156 = arith.cmpi eq, %arg1, %c1_i32 : i32
    %157 = arith.extui %156 : i1 to i32
    %c0_i32_85 = arith.constant 0 : i32
    %158 = arith.cmpi ne, %157, %c0_i32_85 : i32
    scf.if %158 {
      %159 = vector.extract_strided_slice %154 {offsets = [0, 0], sizes = [1, 32], strides = [1, 1]} : vector<8x32xf32> to vector<1x32xf32>
      %c0_86 = arith.constant 0 : index
      %c0_87 = arith.constant 0 : index
      %160 = vector.load %arg18[%c0_86, %c0_87] : memref<32x32xbf16, #tpu.memory_space<vmem>>, vector<32x32xbf16>
      %161 = arith.truncf %159 : vector<1x32xf32> to vector<1x32xbf16>
      %cst_88 = arith.constant dense<0.000000e+00> : vector<1x32xf32>
      %162 = tpu.matmul %161, %160, %cst_88 {dimension_numbers = #tpu.dot_dimension_numbers<[1], [0], [0], [1], [0, 0, 1, 1], [], []>} : vector<1x32xbf16>, vector<32x32xbf16>, vector<1x32xf32> -> vector<1x32xf32>
      %c0_89 = arith.constant 0 : index
      %c0_90 = arith.constant 0 : index
      %163 = vector.load %arg19[%c0_89, %c0_90] : memref<1x32xf32, #tpu.memory_space<vmem>>, vector<1x32xf32>
      %164 = arith.addf %162, %163 : vector<1x32xf32>
      %165 = math.tanh %164 : vector<1x32xf32>
      %c0_91 = arith.constant 0 : index
      %c0_92 = arith.constant 0 : index
      %166 = vector.load %arg20[%c0_91, %c0_92] : memref<32x128xbf16, #tpu.memory_space<vmem>>, vector<32x128xbf16>
      %167 = arith.truncf %165 : vector<1x32xf32> to vector<1x32xbf16>
      %cst_93 = arith.constant dense<0.000000e+00> : vector<1x128xf32>
      %168 = tpu.matmul %167, %166, %cst_93 {dimension_numbers = #tpu.dot_dimension_numbers<[1], [0], [0], [1], [0, 0, 1, 1], [], []>} : vector<1x32xbf16>, vector<32x128xbf16>, vector<1x128xf32> -> vector<1x128xf32>
      %c0_94 = arith.constant 0 : index
      %c0_95 = arith.constant 0 : index
      %169 = vector.load %arg21[%c0_94, %c0_95] : memref<1x128xf32, #tpu.memory_space<vmem>>, vector<1x128xf32>
      %170 = arith.addf %168, %169 : vector<1x128xf32>
      %171 = vector.shape_cast %170 : vector<1x128xf32> to vector<1x128xf32>
      %172 = vector.broadcast %171 : vector<1x128xf32> to vector<8x128xf32>
      %c0_96 = arith.constant 0 : index
      %c0_97 = arith.constant 0 : index
      %c0_98 = arith.constant 0 : index
      %173 = vector.load %arg22[%c0_96, %c0_97, %c0_98] : memref<1x8x128xf32, #tpu.memory_space<vmem>>, vector<1x8x128xf32>
      %174 = vector.shape_cast %173 : vector<1x8x128xf32> to vector<8x128xf32>
      %175 = vector.shape_cast %172 : vector<8x128xf32> to vector<1x8x128xf32>
      tpu.vector_store %arg22[%c0_96, %c0_97, %c0_98], %175 {strides = array<i32>} : memref<1x8x128xf32, #tpu.memory_space<vmem>>, vector<1x8x128xf32>,
    } else {
    }
    return
  }
  func.func @transform_0(%arg0: i32, %arg1: i32) -> (i32, i32, i32) {
    %c0_i32 = arith.constant 0 : i32
    %c0_i32_0 = arith.constant 0 : i32
    %c0_i32_1 = arith.constant 0 : i32
    return %arg0, %c0_i32, %c0_i32_0 : i32, i32, i32
  }
  func.func @transform_1(%arg0: i32, %arg1: i32) -> (i32, i32, i32) {
    %c0_i32 = arith.constant 0 : i32
    %c0_i32_0 = arith.constant 0 : i32
    %c0_i32_1 = arith.constant 0 : i32
    return %arg0, %c0_i32, %c0_i32_0 : i32, i32, i32
  }
  func.func @transform_2(%arg0: i32, %arg1: i32) -> (i32, i32) {
    %c0_i32 = arith.constant 0 : i32
    %c0_i32_0 = arith.constant 0 : i32
    %c0_i32_1 = arith.constant 0 : i32
    return %c0_i32, %c0_i32_0 : i32, i32
  }
  func.func @transform_3(%arg0: i32, %arg1: i32) -> (i32, i32) {
    %c0_i32 = arith.constant 0 : i32
    %c0_i32_0 = arith.constant 0 : i32
    %c0_i32_1 = arith.constant 0 : i32
    return %c0_i32, %c0_i32_0 : i32, i32
  }
  func.func @transform_4(%arg0: i32, %arg1: i32) -> (i32, i32, i32) {
    %c0_i32 = arith.constant 0 : i32
    %c0_i32_0 = arith.constant 0 : i32
    %c0_i32_1 = arith.constant 0 : i32
    return %arg1, %c0_i32, %c0_i32_0 : i32, i32, i32
  }
  func.func @transform_5(%arg0: i32, %arg1: i32) -> (i32, i32, i32) {
    %c0_i32 = arith.constant 0 : i32
    %c0_i32_0 = arith.constant 0 : i32
    %c0_i32_1 = arith.constant 0 : i32
    return %arg1, %c0_i32, %c0_i32_0 : i32, i32, i32
  }
  func.func @transform_6(%arg0: i32, %arg1: i32) -> (i32, i32, i32) {
    %c0_i32 = arith.constant 0 : i32
    %c0_i32_0 = arith.constant 0 : i32
    %c0_i32_1 = arith.constant 0 : i32
    return %arg1, %c0_i32, %c0_i32_0 : i32, i32, i32
  }
  func.func @transform_7(%arg0: i32, %arg1: i32) -> (i32, i32, i32) {
    %c0_i32 = arith.constant 0 : i32
    %c0_i32_0 = arith.constant 0 : i32
    %c0_i32_1 = arith.constant 0 : i32
    return %arg1, %c0_i32, %c0_i32_0 : i32, i32, i32
  }
  func.func @transform_8(%arg0: i32, %arg1: i32) -> (i32, i32, i32) {
    %c0_i32 = arith.constant 0 : i32
    %c0_i32_0 = arith.constant 0 : i32
    %c0_i32_1 = arith.constant 0 : i32
    return %arg1, %c0_i32, %c0_i32_0 : i32, i32, i32
  }
  func.func @transform_9(%arg0: i32, %arg1: i32) -> (i32, i32, i32) {
    %c0_i32 = arith.constant 0 : i32
    %c0_i32_0 = arith.constant 0 : i32
    %c0_i32_1 = arith.constant 0 : i32
    return %arg1, %c0_i32, %c0_i32_0 : i32, i32, i32
  }
  func.func @transform_10(%arg0: i32, %arg1: i32) -> (i32, i32, i32) {
    %c0_i32 = arith.constant 0 : i32
    %c0_i32_0 = arith.constant 0 : i32
    %c0_i32_1 = arith.constant 0 : i32
    return %arg1, %c0_i32, %c0_i32_0 : i32, i32, i32
  }
  func.func @transform_11(%arg0: i32, %arg1: i32) -> (i32, i32, i32) {
    %c0_i32 = arith.constant 0 : i32
    %c0_i32_0 = arith.constant 0 : i32
    %c0_i32_1 = arith.constant 0 : i32
    return %arg1, %c0_i32, %c0_i32_0 : i32, i32, i32
  }
  func.func @transform_12(%arg0: i32, %arg1: i32) -> (i32, i32, i32) {
    %c0_i32 = arith.constant 0 : i32
    %c0_i32_0 = arith.constant 0 : i32
    %c0_i32_1 = arith.constant 0 : i32
    return %arg1, %c0_i32, %c0_i32_0 : i32, i32, i32
  }
  func.func @transform_13(%arg0: i32, %arg1: i32) -> (i32, i32, i32) {
    %c0_i32 = arith.constant 0 : i32
    %c0_i32_0 = arith.constant 0 : i32
    %c0_i32_1 = arith.constant 0 : i32
    return %arg1, %c0_i32, %c0_i32_0 : i32, i32, i32
  }
  func.func @transform_14(%arg0: i32, %arg1: i32) -> (i32, i32, i32) {
    %c0_i32 = arith.constant 0 : i32
    %c0_i32_0 = arith.constant 0 : i32
    %c0_i32_1 = arith.constant 0 : i32
    return %arg1, %c0_i32, %c0_i32_0 : i32, i32, i32
  }
  func.func @transform_15(%arg0: i32, %arg1: i32) -> (i32, i32, i32) {
    %c0_i32 = arith.constant 0 : i32
    %c0_i32_0 = arith.constant 0 : i32
    %c0_i32_1 = arith.constant 0 : i32
    return %arg1, %c0_i32, %c0_i32_0 : i32, i32, i32
  }
  func.func @transform_16(%arg0: i32, %arg1: i32) -> (i32, i32) {
    %c0_i32 = arith.constant 0 : i32
    %c0_i32_0 = arith.constant 0 : i32
    %c0_i32_1 = arith.constant 0 : i32
    return %c0_i32, %c0_i32_0 : i32, i32
  }
  func.func @transform_17(%arg0: i32, %arg1: i32) -> (i32, i32) {
    %c0_i32 = arith.constant 0 : i32
    %c0_i32_0 = arith.constant 0 : i32
    %c0_i32_1 = arith.constant 0 : i32
    return %c0_i32, %c0_i32_0 : i32, i32
  }
  func.func @transform_18(%arg0: i32, %arg1: i32) -> (i32, i32) {
    %c0_i32 = arith.constant 0 : i32
    %c0_i32_0 = arith.constant 0 : i32
    %c0_i32_1 = arith.constant 0 : i32
    return %c0_i32, %c0_i32_0 : i32, i32
  }
  func.func @transform_19(%arg0: i32, %arg1: i32) -> (i32, i32) {
    %c0_i32 = arith.constant 0 : i32
    %c0_i32_0 = arith.constant 0 : i32
    %c0_i32_1 = arith.constant 0 : i32
    return %c0_i32, %c0_i32_0 : i32, i32
  }
  func.func @transform_20(%arg0: i32, %arg1: i32) -> (i32, i32, i32) {
    %c0_i32 = arith.constant 0 : i32
    %c0_i32_0 = arith.constant 0 : i32
    %c0_i32_1 = arith.constant 0 : i32
    return %arg0, %c0_i32, %c0_i32_0 : i32, i32, i32
  }
}

</mosaic_0001>

<bundles_post_ra>
// kernel: tpu_custom_call.1
= control target key start
LH: loop header
LB: loop body
LE: loop exit
PB: predicated region body
PF: predicated region fallthrough
CT: control target
= control target key end

     0   :  { %s4061_s0 = inlined_call_operand.hbm [shape: f32[2,8,32], index: 0, kind: input, shape index: {}]   ;;  %s4062_s1 = inlined_call_operand.hbm [shape: f32[2,1,8], index: 1, kind: input, shape index: {}]   ;;  %s4063_s2 = inlined_call_operand.hbm [shape: f32[1,32], index: 2, kind: input, shape index: {}]   ;;  %s4064_s3 = inlined_call_operand.hbm [shape: f32[1,32], index: 3, kind: input, shape index: {}]   ;;  %s4065_s4 = inlined_call_operand.vmem [shape: bf16[2,32,96], index: 4, kind: input, shape index: {}]   ;;  %s4066_s5 = inlined_call_operand.hbm [shape: f32[2,1,96], index: 5, kind: input, shape index: {}]   ;;  %s4067_s6 = inlined_call_operand.vmem [shape: bf16[2,32,32], index: 6, kind: input, shape index: {}]   ;;  %s4068_s7 = inlined_call_operand.hbm [shape: f32[2,1,32], index: 7, kind: input, shape index: {}]   ;;  %s4069_s8 = inlined_call_operand.hbm [shape: f32[2,1,32], index: 8, kind: input, shape index: {}]   ;;  %s4070_s9 = inlined_call_operand.hbm [shape: f32[2,1,32], index: 9, kind: input, shape index: {}]   ;;  %s4071_s10 = inlined_call_operand.vmem [shape: bf16[2,32,64], index: 10, kind: input, shape index: {}]   ;;  %s4072_s11 = inlined_call_operand.hbm [shape: f32[2,1,64], index: 11, kind: input, shape index: {}]   ;;  %s4073_s12 = inlined_call_operand.vmem [shape: bf16[2,64,32], index: 12, kind: input, shape index: {}]   ;;  %s4074_s13 = inlined_call_operand.hbm [shape: f32[2,1,32], index: 13, kind: input, shape index: {}]   ;;  %s4075_s14 = inlined_call_operand.hbm [shape: f32[2,1,32], index: 14, kind: input, shape index: {}]   ;;  %s4076_s15 = inlined_call_operand.hbm [shape: f32[2,1,32], index: 15, kind: input, shape index: {}]   ;;  %s4077_s16 = inlined_call_operand.vmem [shape: bf16[32,32], index: 16, kind: input, shape index: {}]   ;;  %s4078_s17 = inlined_call_operand.hbm [shape: f32[1,32], index: 17, kind: input, shape index: {}]   ;;  %s4079_s18 = inlined_call_operand.vmem [shape: bf16[32,128], index: 18, kind: input, shape index: {}]   ;;  %s4080_s19 = inlined_call_operand.vmem [shape: f32[1,128], index: 19, kind: input, shape index: {}]   ;;  %s4081_s20 = inlined_call_operand.hbm [shape: f32[2,8,128], index: 20, kind: output, shape index: {}]  }
   0x1   :  { %4127 = sst [smem:[#allocation52_spill]] %s4061_s0 }
   0x2   :  { %4128 = sst [smem:[#allocation53_spill]] %s4062_s1 }
   0x3   :  { %4129 = sst [smem:[#allocation54_spill]] %s4063_s2 }
   0x4   :  { %4130 = sst [smem:[#allocation55_spill]] %s4064_s3 }
   0x5   :  { %4131 = sst [smem:[#allocation56_spill]] %s4065_s4 }
   0x6   :  { %4132 = sst [smem:[#allocation57_spill]] %s4066_s5 }
   0x7   :  { %4133 = sst [smem:[#allocation58_spill]] %s4067_s6 }
   0x8   :  { %4134 = sst [smem:[#allocation59_spill]] %s4068_s7 }
   0x9   :  { %4135 = sst [smem:[#allocation60_spill]] %s4069_s8 }
   0xa   :  { %4136 = sst [smem:[#allocation61_spill]] %s4070_s9 }
   0xb   :  { %4137 = sst [smem:[#allocation62_spill]] %s4071_s10 }
   0xc   :  { %4138 = sst [smem:[#allocation63_spill]] %s4072_s11 }
   0xd   :  { %4139 = sst [smem:[#allocation64_spill]] %s4073_s12 }
   0xe   :  { %4140 = sst [smem:[#allocation65_spill]] %s4074_s13 }
   0xf   :  { %4141 = sst [smem:[#allocation66_spill]] %s4075_s14 }
  0x10   :  { %4142 = sst [smem:[#allocation67_spill]] %s4076_s15 }
  0x11   :  { %4143 = sst [smem:[#allocation68_spill]] %s4077_s16 }
  0x12   :  { %4144 = sst [smem:[#allocation69_spill]] %s4078_s17 }
  0x13   :  { %4145 = sst [smem:[#allocation70_spill]] %s4079_s18 }
  0x14   :  { %4146 = sst [smem:[#allocation71_spill]] %s4080_s19 }
  0x15   :  { %4147 = sst [smem:[#allocation72_spill]] %s4081_s20 }
  0x16   :  { %25 = vsyncpa [#allocation6], 0 }
  0x17   :  { %27 = vsyncpa [#allocation6 + $0x1], 0 }
  0x18   :  { %28 = vsyncpa [#allocation9], 0 }
  0x19   :  { %30 = vsyncpa [#allocation9 + $0x1], 0 }
  0x1a   :  { %31 = vsyncpa [#allocation12], 0 }
  0x1b   :  { %32 = vsyncpa [#allocation7], 0 }
  0x1c   :  { %34 = vsyncpa [#allocation7 + $0x1], 0  ;;  %s3258_s1 = smov 0   ;;  %s3260_s22 = smov 0  }
  0x1d   :  { %s3262_s23 = smov 0   ;;  %s3264_s24 = smov 0  }
  0x1e   :  { %s3266_s2 = smov 0   ;;  %s3268_s25 = smov 0  }
  0x1f   :  { %s3270_s3 = smov 0   ;;  %s3272_s26 = smov 0  }
  0x20   :  { %s3274_s27 = smov 0   ;;  %s3276_s28 = smov 0  }
  0x21   :  { %s3278_s4 = smov 0  }
  0x22 LB: > { %4148 = sst [smem:[#allocation37_spill]] %s3091_s22  ;;  %s3312_s29 = sadd.s32 4294967295, %s3127_s4   ;;  %s3127_s4 = sphi %s3278_s4, %s40_s4   ;;  %s3123_s28 = sphi %s3276_s28, %s4260_s28   ;;  %s3119_s27 = sphi %s3274_s27, %s4259_s27   ;;  %s3115_s26 = sphi %s3272_s26, %s4258_s26   ;;  %s3111_s3 = sphi %s3270_s3, %s4257_s3   ;;  %s3107_s25 = sphi %s3268_s25, %s4256_s25   ;;  %s3103_s2 = sphi %s3266_s2, %s4255_s2   ;;  %s3099_s24 = sphi %s3264_s24, %s4249_s24   ;;  %s3095_s23 = sphi %s3262_s23, %s4254_s23   ;;  %s3091_s22 = sphi %s3260_s22, %s4253_s22   ;;  %s3087_s1 = sphi %s3258_s1, %s4247_s1  }
  0x23   : > { %4149 = sst [smem:[#allocation38_spill]] %s3099_s24  ;;  %p192_p0 = scmp.ne.s32.totalorder %s3091_s22, %s3087_s1 }
  0x24   : > { %4150 = sst [smem:[#allocation39_spill]] %s3103_s2  ;;  %p4090_p1 = scmp.eq.s32.totalorder %s3312_s29, 0 }
  0x25   : > { %4151 = sst [smem:[#allocation40_spill]] %s3111_s3  ;;  %p2168_p2 = scmp.ge.s32.totalorder %s3127_s4, 1 }
  0x26   : > { %4152 = sst [smem:[#allocation41_spill]] %s3115_s26  ;;  %p573_p3 = scmp.lt.s32.totalorder %s3127_s4, 5 }
  0x27   : > { %4153 = sst [smem:[#allocation42_spill]] %s3312_s29  ;;  %p3320_p4 = por %p192_p0, %p4090_p1 }
  0x28   : > { %p3324_p5 = pnand %p2168_p2, %p573_p3  ;;  %s3129_s21 = smov [#allocation10]  }
  0x29   : > { %s4154_s30 = scalar_select %p3320_p4, 1, 0 }
  0x2a   : > { %s4156_s0 = scalar_select %p3324_p5, 1, 0 }
  0x2b   : > { %4155 = sst [smem:[#allocation43_spill]] %s4154_s30  ;;  %s586_s20 = sshll.u32 %s3129_s21, 4  ;;  %s587_s20 = int_to_ptr.vmem [resolvable:$true] %s586_s20 }
  0x2c   : > { %4157 = sst [smem:[#allocation44_spill]] %s4156_s0  ;;  %p2385_p6 = pneg %p3324_p5 }
  0x2d   : > { %s4159_s18 = sld [smem:[#allocation54_spill]] }
  0x2e   : > { %p3332_p7 = pnand %p2385_p6, %p4090_p1 }
  0x30   : > { %s4158_s1 = scalar_select %p3332_p7, 1, 0 }
  0x31   : > { %p3344_p9 = pneg %p3332_p7 }
  0x33   : > { %s2573_s16 = scalar_lea.hbm %s4159_s18, 16 }
  0x34   : > { %p2574_p8 = scmp.ne.s32.totalorder %s4159_s18, %s2573_s16  ;;  %p2580_p12 = scmp.lt.u32.totalorder %s2573_s16, %s4159_s18 }
  0x35   : > { %s4160_s21 = scalar_select %p3344_p9, 1, 0 }
  0x36   : > { %p2576_p10 = pnand %p3344_p9, %p2574_p8 }
  0x38   : > { %p2577_p11 = pneg %p2576_p10 }
  0x3a   : > { %p2582_p13 = pnand %p2580_p12, %p2577_p11 }
  0x3c   : > { %2585 = shalt.err (!%p2582_p13)
}
  0x3d   : > { %s2586_s19 = scalar_lea.vmem %s587_s20, 16  ;;  %s2593_s10 = scalar_lea.vmem %s587_s20, 32 }
  0x3e   : > { %p2587_p0 = scmp.ne.s32.totalorder %s587_s20, %s2586_s19  ;;  %p2594_p6 = scmp.lt.s32.totalorder %s587_s20, %s587_s20 }
  0x3f   : > { %p2595_p1 = scmp.lt.s32.totalorder %s2593_s10, %s2586_s19 }
  0x40   : > { %p2589_p2 = pnand %p2587_p0, %p3344_p9 }
  0x41   : > { %p2596_p4 = por %p2595_p1, %p2594_p6 }
  0x42   : > { %p2590_p3 = pneg %p2589_p2 }
  0x44   : > { %p2597_p5 = pnand %p2596_p4, %p2590_p3 }
  0x46   : > { %2600 = shalt.err (!%p2597_p5)
}
  0x47   : > { %2388 = dma.hbm_to_vmem [thread:$0]  (!%p3332_p7), %s4159_s18, 16, %s587_s20, [#allocation9]  }
  0x48   : > { %s2167_s6 = sadd.s32 4294967294, %s3127_s4   ;;  %s49_s16 = sadd.s32 1, %s3119_s27 }
  0x49   : > { %s52_s3 = sadd.s32 1, %s3123_s28  ;;  %p50_p1 = scmp.ge.s32.totalorder %s49_s16, 2 }
  0x4a   : > { %s59_s19 = sadd.s32 1, %s3107_s25  ;;  %p66_p4 = scmp.ne.s32.totalorder %s3107_s25, %s3103_s2 }
  0x4b   : > { %p67_p5 = scmp.eq.s32.totalorder %s3127_s4, 0  ;;  %s4262_s16 = smov (%p50_p1, %s49_s16), 0 }
  0x4c   : > { %4161 = sst [smem:[#allocation45_spill]] %s4262_s16  ;;  %s4264_s3 = smov (!%p50_p1, %s52_s3), %s3123_s28 }
  0x4d   : > { %p3375_p8 = por %p67_p5, %p66_p4  ;;  %p4099_p10 = scmp.ne.s32.totalorder %s3103_s2, %s3099_s24 }
  0x4e   : > { %p54_p11 = scmp.ge.s32.totalorder %s4264_s3, 2  ;;  %s176_s10 = ssub.s32 %s3119_s27, %s4262_s16 }
  0x4f   : > { %p4163_p12 = scmp.eq.s32.totalorder %s3312_s29, 0  ;;  %p177_p0 = scmp.eq.s32.totalorder %s176_s10, 0 }
  0x50   : > { %s4266_s3 = smov (%p54_p11, %s4264_s3), 0  ;;  %s179_s26 = sadd.s32 1, %s3095_s23 }
  0x51   : > { %p3388_p13 = por %p4163_p12, %p4099_p10  ;;  %4166 = sst [smem:[#allocation47_spill]] %s4266_s3 }
  0x52   : > { %p186_p2 = scmp.ne.s32.totalorder %s3095_s23, %s3091_s22  ;;  %s56_s18 = ssub.s32 %s3123_s28, %s4266_s3 }
  0x53   : > { %s4164_s12 = scalar_select %p3388_p13, 1, 0 }
  0x54   : > { %p560_p3 = scmp.eq.s32.totalorder %s3312_s29, 3  ;;  %p57_p6 = scmp.eq.s32.totalorder %s56_s18, 0 }
  0x55   : > { %4165 = sst [smem:[#allocation46_spill]] %s4164_s12  ;;  %p3402_p1 = por %p186_p2, %p67_p5 }
  0x56   : > { %s3407_s30 = scalar_select %p177_p0, %s3095_s23, %s179_s26  }
  0x57   : > { %s3410_s10 = scalar_select %p57_p6, %s3107_s25, %s59_s19  }
  0x58   : > { %4168 = sst [smem:[#allocation48_spill]] %s3407_s30  ;;  %p3415_p11 = por %p560_p3, %p66_p4 }
  0x59   : > { %4169 = sst [smem:[#allocation49_spill]] %s3410_s10  ;;  %p566_p12 = scmp.eq.s32.totalorder %s2167_s6, 3 }
  0x5a   : > { %s4170_s12 = scalar_select %p3415_p11, 1, 0 }
  0x5b   : > { %p2433_p10 = scmp.lt.s32.totalorder %s3127_s4, 4  ;;  %p4172_p13 = scmp.ne.s32.totalorder %s3103_s2, %s3099_s24 }
  0x5c   : > { %4171 = sst [smem:[#allocation50_spill]] %s4170_s12  ;;  %s4109_s22 = sand.u32 1, %s3107_s25  }
  0x5d   : > { %p3424_p7 = por %p566_p12, %p4172_p13  ;;  %s2174_s29 = sshll.u32 %s3123_s28, 7 }
  0x5e   : > { %s2173_s26 = sshll.u32 %s4109_s22, 3  ;;  %s4175_s10 = sld [smem:[#allocation52_spill]] }
  0x5f   : > { %s4173_s18 = scalar_select %p3424_p7, 1, 0 }
  0x60   : > { %p3439_p4 = pnand %p2433_p10, %p3375_p8  ;;  %s632_s3 = scalar_lea.vmem [#allocation5], %s2173_s26 }
  0x61   : > { %4174 = sst [smem:[#allocation51_spill]] %s4173_s18  ;;  %s639_s18 = sshll.u32 %s632_s3, 4  ;;  %s3449_s18 = int_to_ptr.vmem [resolvable:$true] %s639_s18 }
  0x62   : > { %p3445_p5 = pnand %p2433_p10, %p3402_p1  ;;  %p2603_p8 = pneg %p3439_p4 }
  0x64   : > { %s3435_s0 = scalar_lea.hbm %s4175_s10, %s2174_s29  ;;  %s4178_s29 = sand.u32 1, %s3127_s4  }
  0x65   : > { %s4177_s22 = scalar_select %p3445_p5, 1, 0 }
  0x66   : > { %s3453_s30 = scalar_lea.sflag [#allocation6], %s4178_s29  ;;  %s2601_s20 = scalar_lea.hbm %s3435_s0, 128 }
  0x67   : > { %p2602_p13 = scmp.ne.s32.totalorder %s3435_s0, %s2601_s20  ;;  %s2606_s16 = scalar_lea.hbm %s4175_s10, 256 }
  0x68   : > { %p2607_p10 = scmp.lt.u32.totalorder %s3435_s0, %s4175_s10  ;;  %p2608_p3 = scmp.lt.u32.totalorder %s2606_s16, %s2601_s20 }
  0x69   : > { %p2604_p0 = pnand %p2603_p8, %p2602_p13  ;;  %p2610_p1 = scmp.lt.u32.totalorder %s2601_s20, %s3435_s0 }
  0x6a   : > { %p2609_p6 = por %p2608_p3, %p2607_p10 }
  0x6b   : > { %p2605_p2 = pneg %p2604_p0 }
  0x6c   : > { %p2611_p12 = por %p2610_p1, %p2609_p6 }
  0x6e   : > { %p2612_p7 = pnand %p2611_p12, %p2605_p2 }
  0x70   : > { %2615 = shalt.err (!%p2612_p7)
}
  0x71   : > { %s2616_s29 = scalar_lea.vmem %s3449_s18, 128  ;;  %s3130_s26 = smov [#allocation5]  }
  0x72   : > { %p2617_p13 = scmp.ne.s32.totalorder %s3449_s18, %s2616_s29  ;;  %s2621_s3 = sshll.u32 %s3130_s26, 4  ;;  %s2622_s3 = int_to_ptr.vmem [resolvable:$false] %s2621_s3 }
  0x73   : > { %s2623_s24 = scalar_lea.vmem %s2622_s3, 256  ;;  %p2624_p9 = scmp.lt.s32.totalorder %s3449_s18, %s2622_s3 }
  0x74   : > { %p2619_p0 = pnand %p2617_p13, %p2603_p8  ;;  %p2625_p10 = scmp.lt.s32.totalorder %s2623_s24, %s2616_s29 }
  0x76   : > { %p2620_p11 = pneg %p2619_p0  ;;  %p2626_p3 = por %p2625_p10, %p2624_p9 }
  0x78   : > { %p2627_p6 = pnand %p2626_p3, %p2620_p11 }
  0x7a   : > { %2630 = shalt.err (!%p2627_p6)
}
  0x7b   : > { %2398 = dma.hbm_to_vmem [thread:$0]  (!%p3439_p4), %s3435_s0, 128, %s3449_s18, %s3453_s30  }
  0x7c   : > { %s2175_s20 = sshll.u32 %s3123_s28, 4  ;;  %s4179_s26 = sld [smem:[#allocation53_spill]] }
  0x7d   : > { %s4181_s29 = sand.u32 1, %s3107_s25   ;;  %s3492_s2 = sand.u32 1, %s3095_s23  }
  0x7e   : > { %s649_s24 = scalar_lea.vmem [#allocation8], %s4181_s29  ;;  %s4182_s15 = sand.u32 1, %s3127_s4  }
  0x7f   : > { %s656_s12 = sshll.u32 %s649_s24, 4  ;;  %s3496_s14 = scalar_lea.sflag [#allocation9], %s4182_s15  ;;  %s3489_s12 = int_to_ptr.vmem [resolvable:$true] %s656_s12 }
  0x82   : > { %s4180_s10 = smov %s4179_s26  ;;  %s3485_s3 = scalar_lea.hbm %s4179_s26, %s2175_s20 }
  0x83   : > { %s2631_s0 = scalar_lea.hbm %s3485_s3, 16  ;;  %s2636_s16 = scalar_lea.hbm %s4180_s10, 32 }
  0x84   : > { %p2632_p7 = scmp.ne.s32.totalorder %s3485_s3, %s2631_s0  ;;  %p2637_p2 = scmp.lt.u32.totalorder %s3485_s3, %s4180_s10 }
  0x85   : > { %p2638_p1 = scmp.lt.u32.totalorder %s2636_s16, %s2631_s0  ;;  %p2640_p13 = scmp.lt.u32.totalorder %s2631_s0, %s3485_s3 }
  0x86   : > { %p2634_p9 = pnand %p2632_p7, %p2603_p8 }
  0x87   : > { %p2639_p12 = por %p2638_p1, %p2637_p2 }
  0x88   : > { %p2635_p11 = pneg %p2634_p9 }
  0x89   : > { %p2641_p0 = por %p2640_p13, %p2639_p12 }
  0x8b   : > { %p2642_p10 = pnand %p2641_p0, %p2635_p11 }
  0x8d   : > { %2645 = shalt.err (!%p2642_p10)
}
  0x8e   : > { %s2646_s15 = scalar_lea.vmem %s3489_s12, 16  ;;  %s3131_s29 = smov [#allocation8]  }
  0x8f   : > { %p2647_p3 = scmp.ne.s32.totalorder %s3489_s12, %s2646_s15  ;;  %s2651_s24 = sshll.u32 %s3131_s29, 4  ;;  %s2652_s24 = int_to_ptr.vmem [resolvable:$false] %s2651_s24 }
  0x90   : > { %s2653_s18 = scalar_lea.vmem %s2652_s24, 32  ;;  %p2654_p9 = scmp.lt.s32.totalorder %s3489_s12, %s2652_s24 }
  0x91   : > { %p2649_p6 = pnand %p2647_p3, %p2603_p8  ;;  %p2655_p2 = scmp.lt.s32.totalorder %s2653_s18, %s2646_s15 }
  0x93   : > { %p2650_p7 = pneg %p2649_p6  ;;  %p2656_p1 = por %p2655_p2, %p2654_p9 }
  0x95   : > { %p2657_p12 = pnand %p2656_p1, %p2650_p7 }
  0x97   : > { %2660 = shalt.err (!%p2657_p12)
}
  0x98   : > { %2401 = dma.hbm_to_vmem [thread:$0]  (!%p3439_p4), %s3485_s3, 16, %s3489_s12, %s3496_s14  }
  0x99   : > { %s3523_s0 = sshll.u32 %s3119_s27, 4  ;;  %s4183_s5 = sld [smem:[#allocation57_spill]] }
  0x9a   : > { %s674_s6 = scalar_lea.vmem [#allocation13], %s3492_s2  ;;  %p3536_p11 = pneg %p3445_p5 }
  0x9b   : > { %s681_s26 = sshll.u32 %s674_s6, 4  ;;  %s682_s26 = int_to_ptr.vmem [resolvable:$true] %s681_s26 }
  0x9f   : > { %s3529_s19 = scalar_lea.hbm %s4183_s5, %s3523_s0  ;;  %s2666_s24 = scalar_lea.hbm %s4183_s5, 32 }
  0xa0   : > { %s2661_s15 = scalar_lea.hbm %s3529_s19, 16  ;;  %p2667_p0 = scmp.lt.u32.totalorder %s3529_s19, %s4183_s5 }
  0xa1   : > { %p2662_p8 = scmp.ne.s32.totalorder %s3529_s19, %s2661_s15  ;;  %p2668_p10 = scmp.lt.u32.totalorder %s2666_s24, %s2661_s15 }
  0xa2   : > { %p2670_p6 = scmp.lt.u32.totalorder %s2661_s15, %s3529_s19 }
  0xa3   : > { %p2664_p4 = pnand %p3536_p11, %p2662_p8  ;;  %p2669_p3 = por %p2668_p10, %p2667_p0 }
  0xa5   : > { %p2665_p13 = pneg %p2664_p4  ;;  %p2671_p7 = por %p2670_p6, %p2669_p3 }
  0xa7   : > { %p2672_p9 = pnand %p2671_p7, %p2665_p13 }
  0xa9   : > { %2675 = shalt.err (!%p2672_p9)
}
  0xaa   : > { %s2676_s16 = scalar_lea.vmem %s682_s26, 16  ;;  %s3132_s6 = smov [#allocation13]  }
  0xab   : > { %p2677_p2 = scmp.ne.s32.totalorder %s682_s26, %s2676_s16  ;;  %s2681_s10 = sshll.u32 %s3132_s6, 4  ;;  %s2682_s10 = int_to_ptr.vmem [resolvable:$false] %s2681_s10 }
  0xac   : > { %s2683_s3 = scalar_lea.vmem %s2682_s10, 32  ;;  %p2684_p8 = scmp.lt.s32.totalorder %s682_s26, %s2682_s10 }
  0xad   : > { %p2679_p1 = pnand %p2677_p2, %p3536_p11  ;;  %p2685_p4 = scmp.lt.s32.totalorder %s2683_s3, %s2676_s16 }
  0xaf   : > { %p2680_p12 = pneg %p2679_p1  ;;  %p2686_p5 = por %p2685_p4, %p2684_p8 }
  0xb1   : > { %p2687_p0 = pnand %p2686_p5, %p2680_p12 }
  0xb3   : > { %2690 = shalt.err (!%p2687_p0)
}
  0xb4   : > { %p4185_p10 = scmp.ne.s32.totalorder %s4177_s22, 0  ;;  %s4186_s7 = sld [smem:[#allocation59_spill]] }
  0xb5   : > { %s699_s10 = scalar_lea.vmem [#allocation14], %s3492_s2 }
  0xb6   : > { %2404 = dma.hbm_to_vmem [thread:$0]  (!%p4185_p10), %s3529_s19, 16, %s682_s26, %s3453_s30  }
  0xb7   : > { %s706_s18 = sshll.u32 %s699_s10, 4  ;;  %s707_s18 = int_to_ptr.vmem [resolvable:$true] %s706_s18 }
  0xba   : > { %s3560_s24 = scalar_lea.hbm %s4186_s7, %s3523_s0  ;;  %s2696_s19 = scalar_lea.hbm %s4186_s7, 32 }
  0xbb   : > { %s2691_s20 = scalar_lea.hbm %s3560_s24, 16  ;;  %p2697_p6 = scmp.lt.u32.totalorder %s3560_s24, %s4186_s7 }
  0xbc   : > { %p2692_p5 = scmp.ne.s32.totalorder %s3560_s24, %s2691_s20  ;;  %p2698_p7 = scmp.lt.u32.totalorder %s2696_s19, %s2691_s20 }
  0xbd   : > { %p2700_p2 = scmp.lt.u32.totalorder %s2691_s20, %s3560_s24 }
  0xbe   : > { %p2694_p13 = pnand %p2692_p5, %p3536_p11  ;;  %p2699_p9 = por %p2698_p7, %p2697_p6 }
  0xc0   : > { %p2695_p3 = pneg %p2694_p13  ;;  %p2701_p1 = por %p2700_p2, %p2699_p9 }
  0xc2   : > { %p2702_p12 = pnand %p2701_p1, %p2695_p3 }
  0xc4   : > { %2705 = shalt.err (!%p2702_p12)
}
  0xc5   : > { %s2706_s15 = scalar_lea.vmem %s707_s18, 16  ;;  %s3133_s29 = smov [#allocation14]  }
  0xc6   : > { %p2707_p8 = scmp.ne.s32.totalorder %s707_s18, %s2706_s15  ;;  %s2711_s10 = sshll.u32 %s3133_s29, 4  ;;  %s2712_s10 = int_to_ptr.vmem [resolvable:$false] %s2711_s10 }
  0xc7   : > { %s2713_s16 = scalar_lea.vmem %s2712_s10, 32  ;;  %p2714_p5 = scmp.lt.s32.totalorder %s707_s18, %s2712_s10 }
  0xc8   : > { %p2709_p4 = pnand %p2707_p8, %p3536_p11  ;;  %p2715_p13 = scmp.lt.s32.totalorder %s2713_s16, %s2706_s15 }
  0xca   : > { %p2710_p0 = pneg %p2709_p4  ;;  %p2716_p10 = por %p2715_p13, %p2714_p5 }
  0xcc   : > { %p2717_p6 = pnand %p2716_p10, %p2710_p0 }
  0xce   : > { %2720 = shalt.err (!%p2717_p6)
}
  0xcf   : > { %p4187_p7 = scmp.ne.s32.totalorder %s4177_s22, 0  ;;  %s4188_s8 = sld [smem:[#allocation60_spill]] }
  0xd0   : > { %s716_s26 = scalar_lea.vmem [#allocation15], %s3492_s2 }
  0xd1   : > { %2407 = dma.hbm_to_vmem [thread:$0]  (!%p4187_p7), %s3560_s24, 16, %s707_s18, %s3496_s14  }
  0xd2   : > { %s723_s3 = sshll.u32 %s716_s26, 4  ;;  %s724_s3 = int_to_ptr.vmem [resolvable:$true] %s723_s3 }
  0xd5   : > { %s3585_s19 = scalar_lea.hbm %s4188_s8, %s3523_s0  ;;  %s2726_s24 = scalar_lea.hbm %s4188_s8, 32 }
  0xd6   : > { %s2721_s15 = scalar_lea.hbm %s3585_s19, 16  ;;  %p2727_p2 = scmp.lt.u32.totalorder %s3585_s19, %s4188_s8 }
  0xd7   : > { %p2722_p10 = scmp.ne.s32.totalorder %s3585_s19, %s2721_s15  ;;  %p2728_p1 = scmp.lt.u32.totalorder %s2726_s24, %s2721_s15 }
  0xd8   : > { %p2730_p8 = scmp.lt.u32.totalorder %s2721_s15, %s3585_s19 }
  0xd9   : > { %p2724_p3 = pnand %p2722_p10, %p3536_p11  ;;  %p2729_p12 = por %p2728_p1, %p2727_p2 }
  0xdb   : > { %p2725_p9 = pneg %p2724_p3  ;;  %p2731_p4 = por %p2730_p8, %p2729_p12 }
  0xdd   : > { %p2732_p0 = pnand %p2731_p4, %p2725_p9 }
  0xdf   : > { %2735 = shalt.err (!%p2732_p0)
}
  0xe0   : > { %s2736_s20 = scalar_lea.vmem %s724_s3, 16  ;;  %s3134_s6 = smov [#allocation15]  }
  0xe1   : > { %p2737_p5 = scmp.ne.s32.totalorder %s724_s3, %s2736_s20  ;;  %s2741_s26 = sshll.u32 %s3134_s6, 4  ;;  %s2742_s26 = int_to_ptr.vmem [resolvable:$false] %s2741_s26 }
  0xe2   : > { %s2743_s29 = scalar_lea.vmem %s2742_s26, 32  ;;  %p2744_p10 = scmp.lt.s32.totalorder %s724_s3, %s2742_s26 }
  0xe3   : > { %p2739_p13 = pnand %p2737_p5, %p3536_p11  ;;  %p2745_p3 = scmp.lt.s32.totalorder %s2743_s29, %s2736_s20 }
  0xe5   : > { %p2740_p6 = pneg %p2739_p13  ;;  %p2746_p7 = por %p2745_p3, %p2744_p10 }
  0xe7   : > { %p2747_p1 = pnand %p2746_p7, %p2740_p6 }
  0xe9   : > { %2750 = shalt.err (!%p2747_p1)
}
  0xea   : > { %p4189_p2 = scmp.ne.s32.totalorder %s4177_s22, 0  ;;  %s4190_s9 = sld [smem:[#allocation61_spill]] }
  0xeb   : > { %s733_s18 = scalar_lea.vmem [#allocation16], %s3492_s2 }
  0xec   : > { %2410 = dma.hbm_to_vmem [thread:$0]  (!%p4189_p2), %s3585_s19, 16, %s724_s3, %s3453_s30  }
  0xed   : > { %s740_s16 = sshll.u32 %s733_s18, 4  ;;  %s741_s16 = int_to_ptr.vmem [resolvable:$true] %s740_s16 }
  0xf0   : > { %s3610_s24 = scalar_lea.hbm %s4190_s9, %s3523_s0  ;;  %s2756_s19 = scalar_lea.hbm %s4190_s9, 32 }
  0xf1   : > { %s2751_s20 = scalar_lea.hbm %s3610_s24, 16  ;;  %p2757_p8 = scmp.lt.u32.totalorder %s3610_s24, %s4190_s9 }
  0xf2   : > { %p2752_p7 = scmp.ne.s32.totalorder %s3610_s24, %s2751_s20  ;;  %p2758_p4 = scmp.lt.u32.totalorder %s2756_s19, %s2751_s20 }
  0xf3   : > { %p2760_p5 = scmp.lt.u32.totalorder %s2751_s20, %s3610_s24 }
  0xf4   : > { %p2754_p9 = pnand %p2752_p7, %p3536_p11  ;;  %p2759_p0 = por %p2758_p4, %p2757_p8 }
  0xf6   : > { %p2755_p12 = pneg %p2754_p9  ;;  %p2761_p13 = por %p2760_p5, %p2759_p0 }
  0xf8   : > { %p2762_p6 = pnand %p2761_p13, %p2755_p12 }
  0xfa   : > { %2765 = shalt.err (!%p2762_p6)
}
  0xfb   : > { %s2766_s15 = scalar_lea.vmem %s741_s16, 16  ;;  %s3135_s10 = smov [#allocation16]  }
  0xfc   : > { %p2767_p10 = scmp.ne.s32.totalorder %s741_s16, %s2766_s15  ;;  %s2771_s18 = sshll.u32 %s3135_s10, 4  ;;  %s2772_s18 = int_to_ptr.vmem [resolvable:$false] %s2771_s18 }
  0xfd   : > { %s2773_s6 = scalar_lea.vmem %s2772_s18, 32  ;;  %p2774_p7 = scmp.lt.s32.totalorder %s741_s16, %s2772_s18 }
  0xfe   : > { %p2769_p3 = pnand %p2767_p10, %p3536_p11  ;;  %p2775_p9 = scmp.lt.s32.totalorder %s2773_s6, %s2766_s15 }
 0x100   : > { %p2770_p1 = pneg %p2769_p3  ;;  %p2776_p2 = por %p2775_p9, %p2774_p7 }
 0x102   : > { %p2777_p4 = pnand %p2776_p2, %p2770_p1 }
 0x104   : > { %2780 = shalt.err (!%p2777_p4)
}
 0x105   : > { %p4191_p8 = scmp.ne.s32.totalorder %s4177_s22, 0  ;;  %s3136_s20 = smov [#allocation11]  }
 0x106   : > { %s597_s26 = sshll.u32 %s3136_s20, 4  ;;  %s4192_s11 = sld [smem:[#allocation63_spill]]  ;;  %s598_s26 = int_to_ptr.vmem [resolvable:$true] %s597_s26 }
 0x107   : > { %2413 = dma.hbm_to_vmem [thread:$0]  (!%p4191_p8), %s3610_s24, 16, %s741_s16, %s3496_s14  }
 0x108   : > { %s4193_s18 = sld [smem:[#allocation55_spill]]  ;;  %p4194_p12 = scmp.ne.s32.totalorder %s4160_s21, 0 }
 0x10c   : > { %s3635_s29 = scalar_lea.hbm %s4192_s11, %s3523_s0 }
 0x10e   : > { %s2781_s6 = scalar_lea.hbm %s4193_s18, 16 }
 0x10f   : > { %p2782_p2 = scmp.ne.s32.totalorder %s4193_s18, %s2781_s6  ;;  %p2788_p13 = scmp.lt.u32.totalorder %s2781_s6, %s4193_s18 }
 0x111   : > { %p2784_p0 = pnand %p2782_p2, %p4194_p12 }
 0x113   : > { %p2785_p5 = pneg %p2784_p0 }
 0x115   : > { %p2790_p6 = pnand %p2788_p13, %p2785_p5 }
 0x117   : > { %2793 = shalt.err (!%p2790_p6)
}
 0x118   : > { %s2794_s20 = scalar_lea.vmem %s598_s26, 16  ;;  %s2801_s19 = scalar_lea.vmem %s598_s26, 32 }
 0x119   : > { %p2795_p10 = scmp.ne.s32.totalorder %s598_s26, %s2794_s20  ;;  %p2802_p7 = scmp.lt.s32.totalorder %s598_s26, %s598_s26 }
 0x11a   : > { %p2803_p9 = scmp.lt.s32.totalorder %s2801_s19, %s2794_s20 }
 0x11b   : > { %p2797_p3 = pnand %p2795_p10, %p4194_p12 }
 0x11c   : > { %p2804_p4 = por %p2803_p9, %p2802_p7 }
 0x11d   : > { %p2798_p1 = pneg %p2797_p3 }
 0x11f   : > { %p2805_p8 = pnand %p2804_p4, %p2798_p1 }
 0x121   : > { %2808 = shalt.err (!%p2805_p8)
}
 0x122   : > { %p4195_p2 = scmp.ne.s32.totalorder %s4158_s1, 0  ;;  %s758_s3 = scalar_lea.vmem [#allocation17], %s3492_s2 }
 0x123   : > { %s765_s10 = sshll.u32 %s758_s3, 4  ;;  %s4196_s13 = sld [smem:[#allocation65_spill]]  ;;  %s766_s10 = int_to_ptr.vmem [resolvable:$true] %s765_s10 }
 0x124   : > { %2391 = dma.hbm_to_vmem [thread:$0]  (!%p4195_p2), %s4193_s18, 16, %s598_s26, [#allocation12]  }
 0x125   : > { %s2809_s16 = scalar_lea.hbm %s3635_s29, 16  ;;  %s2814_s5 = scalar_lea.hbm %s4192_s11, 32 }
 0x126   : > { %p2810_p8 = scmp.ne.s32.totalorder %s3635_s29, %s2809_s16  ;;  %p2815_p13 = scmp.lt.u32.totalorder %s3635_s29, %s4192_s11 }
 0x127   : > { %p2816_p6 = scmp.lt.u32.totalorder %s2814_s5, %s2809_s16  ;;  %p2818_p3 = scmp.lt.u32.totalorder %s2809_s16, %s3635_s29 }
 0x128   : > { %p2812_p0 = pnand %p2810_p8, %p3536_p11 }
 0x129   : > { %s3660_s24 = scalar_lea.hbm %s4196_s13, %s3523_s0  ;;  %p2817_p10 = por %p2816_p6, %p2815_p13 }
 0x12a   : > { %p2813_p5 = pneg %p2812_p0 }
 0x12b   : > { %p2819_p1 = por %p2818_p3, %p2817_p10 }
 0x12d   : > { %p2820_p7 = pnand %p2819_p1, %p2813_p5 }
 0x12f   : > { %2823 = shalt.err (!%p2820_p7)
}
 0x130   : > { %s2824_s26 = scalar_lea.vmem %s766_s10, 16  ;;  %s3137_s3 = smov [#allocation17]  }
 0x131   : > { %p2825_p9 = scmp.ne.s32.totalorder %s766_s10, %s2824_s26  ;;  %s2829_s15 = sshll.u32 %s3137_s3, 4  ;;  %s2830_s15 = int_to_ptr.vmem [resolvable:$false] %s2829_s15 }
 0x132   : > { %s2831_s6 = scalar_lea.vmem %s2830_s15, 32  ;;  %p2832_p0 = scmp.lt.s32.totalorder %s766_s10, %s2830_s15 }
 0x133   : > { %p2827_p4 = pnand %p2825_p9, %p3536_p11  ;;  %p2833_p2 = scmp.lt.s32.totalorder %s2831_s6, %s2824_s26 }
 0x135   : > { %p2828_p8 = pneg %p2827_p4  ;;  %p2834_p12 = por %p2833_p2, %p2832_p0 }
 0x137   : > { %p2835_p6 = pnand %p2834_p12, %p2828_p8 }
 0x139   : > { %2838 = shalt.err (!%p2835_p6)
}
 0x13a   : > { %p4197_p13 = scmp.ne.s32.totalorder %s4177_s22, 0  ;;  %s783_s8 = scalar_lea.vmem [#allocation18], %s3492_s2 }
 0x13b   : > { %s790_s16 = sshll.u32 %s783_s8, 4  ;;  %s3138_s20 = smov [#allocation21]   ;;  %s3681_s16 = int_to_ptr.vmem [resolvable:$true] %s790_s16 }
 0x13c   : > { %2416 = dma.hbm_to_vmem [thread:$0]  (!%p4197_p13), %s3635_s29, 16, %s766_s10, %s3453_s30  }
 0x13d   : > { %s611_s19 = sshll.u32 %s3138_s20, 4  ;;  %s2839_s5 = scalar_lea.hbm %s3660_s24, 16  ;;  %s612_s19 = int_to_ptr.vmem [resolvable:$true] %s611_s19 }
 0x13e   : > { %p2840_p12 = scmp.ne.s32.totalorder %s3660_s24, %s2839_s5  ;;  %s2844_s3 = scalar_lea.hbm %s4196_s13, 32 }
 0x13f   : > { %p2845_p10 = scmp.lt.u32.totalorder %s3660_s24, %s4196_s13  ;;  %p2846_p3 = scmp.lt.u32.totalorder %s2844_s3, %s2839_s5 }
 0x140   : > { %p2842_p2 = pnand %p2840_p12, %p3536_p11  ;;  %p2848_p7 = scmp.lt.u32.totalorder %s2839_s5, %s3660_s24 }
 0x141   : > { %p2847_p1 = por %p2846_p3, %p2845_p10 }
 0x142   : > { %p2843_p5 = pneg %p2842_p2 }
 0x143   : > { %p2849_p9 = por %p2848_p7, %p2847_p1 }
 0x145   : > { %p2850_p4 = pnand %p2849_p9, %p2843_p5 }
 0x147   : > { %2853 = shalt.err (!%p2850_p4)
}
 0x148   : > { %s2854_s29 = scalar_lea.vmem %s3681_s16, 16  ;;  %s3139_s10 = smov [#allocation18]  }
 0x149   : > { %p2855_p8 = scmp.ne.s32.totalorder %s3681_s16, %s2854_s29  ;;  %s2859_s8 = sshll.u32 %s3139_s10, 4  ;;  %s2860_s8 = int_to_ptr.vmem [resolvable:$false] %s2859_s8 }
 0x14a   : > { %s2861_s20 = scalar_lea.vmem %s2860_s8, 32  ;;  %p2862_p12 = scmp.lt.s32.totalorder %s3681_s16, %s2860_s8 }
 0x14b   : > { %p2857_p0 = pnand %p2855_p8, %p3536_p11  ;;  %p2863_p2 = scmp.lt.s32.totalorder %s2861_s20, %s2854_s29 }
 0x14d   : > { %p2858_p6 = pneg %p2857_p0  ;;  %p2864_p10 = por %p2863_p2, %p2862_p12 }
 0x14f   : > { %p2865_p3 = pnand %p2864_p10, %p2858_p6 }
 0x151   : > { %2868 = shalt.err (!%p2865_p3)
}
 0x152   : > { %2419 = dma.hbm_to_vmem [thread:$0]  (!%p4197_p13), %s3660_s24, 16, %s3681_s16, %s3496_s14  }
 0x153   : > { %s4198_s17 = sld [smem:[#allocation69_spill]]  ;;  %p4199_p1 = scmp.ne.s32.totalorder %s4160_s21, 0 }
 0x159   : > { %s2869_s26 = scalar_lea.hbm %s4198_s17, 16 }
 0x15a   : > { %p2870_p5 = scmp.ne.s32.totalorder %s4198_s17, %s2869_s26  ;;  %p2876_p4 = scmp.lt.u32.totalorder %s2869_s26, %s4198_s17 }
 0x15c   : > { %p2872_p7 = pnand %p2870_p5, %p4199_p1 }
 0x15e   : > { %p2873_p9 = pneg %p2872_p7 }
 0x160   : > { %p2878_p8 = pnand %p2876_p4, %p2873_p9 }
 0x162   : > { %2881 = shalt.err (!%p2878_p8)
}
 0x163   : > { %s2882_s10 = scalar_lea.vmem %s612_s19, 16  ;;  %s2889_s24 = scalar_lea.vmem %s612_s19, 32 }
 0x164   : > { %p2883_p0 = scmp.ne.s32.totalorder %s612_s19, %s2882_s10  ;;  %p2890_p2 = scmp.lt.s32.totalorder %s612_s19, %s612_s19 }
 0x165   : > { %p2891_p10 = scmp.lt.s32.totalorder %s2889_s24, %s2882_s10 }
 0x166   : > { %p2885_p6 = pnand %p2883_p0, %p4199_p1 }
 0x167   : > { %p2892_p3 = por %p2891_p10, %p2890_p2 }
 0x168   : > { %p2886_p12 = pneg %p2885_p6 }
 0x16a   : > { %p2893_p13 = pnand %p2892_p3, %p2886_p12 }
 0x16c   : > { %2896 = shalt.err (!%p2893_p13)
}
 0x16d   : > { %p4200_p5 = scmp.ne.s32.totalorder %s4158_s1, 0  ;;  %s4201_s21 = sld [smem:[#allocation66_spill]] }
 0x16e   : > { %s800_s26 = scalar_lea.vmem [#allocation19], %s3492_s2 }
 0x16f   : > { %2394 = dma.hbm_to_vmem [thread:$0]  (!%p4200_p5), %s4198_s17, 16, %s612_s19, [#allocation12]  }
 0x170   : > { %s807_s3 = sshll.u32 %s800_s26, 4  ;;  %s808_s3 = int_to_ptr.vmem [resolvable:$true] %s807_s3 }
 0x173   : > { %s3727_s7 = scalar_lea.hbm %s4201_s21, %s3523_s0  ;;  %s2902_s19 = scalar_lea.hbm %s4201_s21, 32 }
 0x174   : > { %s2897_s1 = scalar_lea.hbm %s3727_s7, 16  ;;  %p2903_p9 = scmp.lt.u32.totalorder %s3727_s7, %s4201_s21 }
 0x175   : > { %p2898_p13 = scmp.ne.s32.totalorder %s3727_s7, %s2897_s1  ;;  %p2904_p4 = scmp.lt.u32.totalorder %s2902_s19, %s2897_s1 }
 0x176   : > { %p2906_p0 = scmp.lt.u32.totalorder %s2897_s1, %s3727_s7 }
 0x177   : > { %p2900_p1 = pnand %p2898_p13, %p3536_p11  ;;  %p2905_p8 = por %p2904_p4, %p2903_p9 }
 0x179   : > { %p2901_p7 = pneg %p2900_p1  ;;  %p2907_p6 = por %p2906_p0, %p2905_p8 }
 0x17b   : > { %p2908_p12 = pnand %p2907_p6, %p2901_p7 }
 0x17d   : > { %2911 = shalt.err (!%p2908_p12)
}
 0x17e   : > { %s2912_s24 = scalar_lea.vmem %s808_s3, 16  ;;  %s3140_s16 = smov [#allocation19]  }
 0x17f   : > { %p2913_p2 = scmp.ne.s32.totalorder %s808_s3, %s2912_s24  ;;  %s2917_s8 = sshll.u32 %s3140_s16, 4  ;;  %s2918_s8 = int_to_ptr.vmem [resolvable:$false] %s2917_s8 }
 0x180   : > { %s2919_s20 = scalar_lea.vmem %s2918_s8, 32  ;;  %p2920_p5 = scmp.lt.s32.totalorder %s808_s3, %s2918_s8 }
 0x181   : > { %p2915_p10 = pnand %p2913_p2, %p3536_p11  ;;  %p2921_p13 = scmp.lt.s32.totalorder %s2919_s20, %s2912_s24 }
 0x183   : > { %p2916_p3 = pneg %p2915_p10  ;;  %p2922_p1 = por %p2921_p13, %p2920_p5 }
 0x185   : > { %p2923_p4 = pnand %p2922_p1, %p2916_p3 }
 0x187   : > { %2926 = shalt.err (!%p2923_p4)
}
 0x188   : > { %p4202_p9 = scmp.ne.s32.totalorder %s4177_s22, 0  ;;  %s4203_s1 = sld [smem:[#allocation67_spill]] }
 0x189   : > { %s817_s19 = scalar_lea.vmem [#allocation20], %s3492_s2 }
 0x18a   : > { %2422 = dma.hbm_to_vmem [thread:$0]  (!%p4202_p9), %s3727_s7, 16, %s808_s3, %s3453_s30  }
 0x18b   : > { %s824_s29 = sshll.u32 %s817_s19, 4  ;;  %s825_s29 = int_to_ptr.vmem [resolvable:$true] %s824_s29 }
 0x18e   : > { %s4204_s15 = smov %s4203_s1  ;;  %s3752_s6 = scalar_lea.hbm %s4203_s1, %s3523_s0 }
 0x18f   : > { %s2927_s10 = scalar_lea.hbm %s3752_s6, 16  ;;  %s2932_s30 = scalar_lea.hbm %s4204_s15, 32 }
 0x190   : > { %p2928_p7 = scmp.ne.s32.totalorder %s3752_s6, %s2927_s10  ;;  %p2933_p6 = scmp.lt.u32.totalorder %s3752_s6, %s4204_s15 }
 0x191   : > { %p2934_p12 = scmp.lt.u32.totalorder %s2932_s30, %s2927_s10  ;;  %p2936_p10 = scmp.lt.u32.totalorder %s2927_s10, %s3752_s6 }
 0x192   : > { %p2930_p8 = pnand %p2928_p7, %p3536_p11 }
 0x193   : > { %p2935_p2 = por %p2934_p12, %p2933_p6 }
 0x194   : > { %p2931_p0 = pneg %p2930_p8 }
 0x195   : > { %p2937_p3 = por %p2936_p10, %p2935_p2 }
 0x197   : > { %p2938_p5 = pnand %p2937_p3, %p2931_p0 }
 0x199   : > { %2941 = shalt.err (!%p2938_p5)
}
 0x19a   : > { %s2942_s2 = scalar_lea.vmem %s825_s29, 16  ;;  %s3141_s0 = smov [#allocation20]  }
 0x19b   : > { %p2943_p13 = scmp.ne.s32.totalorder %s825_s29, %s2942_s2  ;;  %s2947_s8 = sshll.u32 %s3141_s0, 4  ;;  %s2948_s8 = int_to_ptr.vmem [resolvable:$false] %s2947_s8 }
 0x19c   : > { %s2949_s20 = scalar_lea.vmem %s2948_s8, 32  ;;  %p2950_p7 = scmp.lt.s32.totalorder %s825_s29, %s2948_s8 }
 0x19d   : > { %p2945_p1 = pnand %p2943_p13, %p3536_p11  ;;  %p2951_p8 = scmp.lt.s32.totalorder %s2949_s20, %s2942_s2 }
 0x19f   : > { %p2946_p4 = pneg %p2945_p1  ;;  %p2952_p9 = por %p2951_p8, %p2950_p7 }
 0x1a1   : > { %p2953_p6 = pnand %p2952_p9, %p2946_p4 }
 0x1a3   : > { %2956 = shalt.err (!%p2953_p6)
}
 0x1a4   : > { %p4205_p12 = scmp.ne.s32.totalorder %s4177_s22, 0  ;;  %s4206_s5 = sld [smem:[#allocation44_spill]] }
 0x1a6   : > { %2425 = dma.hbm_to_vmem [thread:$0]  (!%p4205_p12), %s3752_s6, 16, %s825_s29, %s3496_s14  }
 0x1aa   : > { %p4207_p0 = scmp.ne.s32.totalorder %s4206_s5, 0 }
 0x1ab   : > { %s4208_s12 = sld [smem:[#allocation42_spill]] (!%p4207_p0)  ;;  %s4210_s1 = sld [smem:[#allocation46_spill]] (!%p4207_p0) }
 0x1ac   : > { %833 = sbr.rel (%p4207_p0) target bundleno = 3806 (0xede), region = 100  ;;  %s4209_s26 = sld [smem:[#allocation39_spill]] (!%p4207_p0) }
 0x1b1   : > { %s835_s19 = sand.u32 (!%p4207_p0), 1, %s4208_s12   ;;  %p4211_p11 = scmp.ne.s32.totalorder (!%p4207_p0), %s4210_s1, 0 }
 0x1b2   : > { %s3777_s10 = sand.u32 (!%p4207_p0), 1, %s4209_s26   ;;  %s3780_s16 = scalar_lea.sflag (!%p4207_p0), [#allocation6], %s835_s19 }
 0x1b3   : > { %s4125_s24 = sshll.u32 %s3777_s10, 3 }
 0x1b4   : > { %s3784_s22 = scalar_lea.vmem [#allocation5], %s4125_s24 }
 0x1b5   : > { %3030 = dma.done.wait (%p4211_p11), %s3780_s16, 128  }
 0x1b6   : > { %3032 = vsyncadd (%p4211_p11), %s3780_s16, 4294967168  ;;  %s3792_s14 = scalar_lea.sflag [#allocation9], %s835_s19 }
 0x1b7   : > { %3034 = dma.done.wait (%p4211_p11), %s3792_s14, 16  }
 0x1b8   : > { %3036 = vsyncadd (%p4211_p11), %s3792_s14, 4294967280  ;;  %p4212_p9 = scmp.eq.s32.totalorder %s4208_s12, 0 }
 0x1ba   : > { %3038 = dma.done.wait (%p4212_p9), [#allocation9], 16   ;;  %p4213_p2 = pmov %p4212_p9 }
 0x1bc   : > { %3040 = vsyncadd (%p4213_p2), [#allocation9], 4294967280  ;;  %p4214_p10 = pmov %p4213_p2 }
 0x1bd   : > { %p4215_p3 = pmov %p4213_p2 }
 0x1be   : > { %3042 = dma.done.wait (%p4214_p10), [#allocation12], 16  }
 0x1bf   : > { %3044 = vsyncadd (%p4215_p3), [#allocation12], 4294967280  ;;  %s4216_s29 = sld [smem:[#allocation37_spill]]  ;;  %s4217_s30 = sld [smem:[#allocation43_spill]] }
 0x1c5   : > { %s3810_s7 = sand.u32 1, %s4216_s29   ;;  %p4218_p5 = scmp.ne.s32.totalorder %s4217_s30, 0 }
 0x1c7   : > { %3046 = dma.done.wait (%p4218_p5), %s3780_s16, 16  }
 0x1c8   : > { %3048 = vsyncadd (%p4218_p5), %s3780_s16, 4294967280 }
 0x1c9   : > { %3050 = dma.done.wait (%p4218_p5), %s3792_s14, 16  }
 0x1ca   : > { %3052 = vsyncadd (%p4218_p5), %s3792_s14, 4294967280 }
 0x1cb   : > { %3054 = dma.done.wait (%p4218_p5), %s3780_s16, 16  }
 0x1cc   : > { %3056 = vsyncadd (%p4218_p5), %s3780_s16, 4294967280 }
 0x1cd   : > { %3058 = dma.done.wait (%p4218_p5), %s3792_s14, 16  }
 0x1ce   : > { %3060 = vsyncadd (%p4218_p5), %s3792_s14, 4294967280 }
 0x1cf   : > { %3062 = dma.done.wait (%p4218_p5), %s3780_s16, 16  }
 0x1d0   : > { %3064 = vsyncadd (%p4218_p5), %s3780_s16, 4294967280 }
 0x1d1   : > { %3066 = dma.done.wait (%p4218_p5), %s3792_s14, 16  }
 0x1d2   : > { %3068 = vsyncadd (%p4218_p5), %s3792_s14, 4294967280 }
 0x1d3   : > { %3070 = dma.done.wait (%p4218_p5), %s3780_s16, 16  }
 0x1d4   : > { %3072 = vsyncadd (%p4218_p5), %s3780_s16, 4294967280 }
 0x1d5   : > { %3074 = dma.done.wait (%p4218_p5), %s3792_s14, 16  }
 0x1d6   : > { %3076 = vsyncadd (%p4218_p5), %s3792_s14, 4294967280  ;;  %p4219_p13 = pmov %p4213_p2 }
 0x1d7   : > { %p4220_p1 = pmov %p4213_p2 }
 0x1d8   : > { %3078 = dma.done.wait (%p4219_p13), [#allocation12], 16  }
 0x1d9   : > { %3080 = vsyncadd (%p4220_p1), [#allocation12], 4294967280  ;;  %s4221_s19 = sld [smem:[#allocation40_spill]]  ;;  %s4223_s0 = sld [smem:[#allocation58_spill]] }
 0x1da   : > { %s4222_s20 = sld [smem:[#allocation56_spill]]  ;;  %s4224_s3 = sld [smem:[#allocation62_spill]] }
 0x1db   : > { %s4225_s13 = sld [smem:[#allocation64_spill]] }
 0x1df   : > { %p1036_p4 = scmp.lt.s32.totalorder %s4221_s19, 1  ;;  %p2198_p7 = scmp.ne.s32.totalorder %s4221_s19, 0 }
 0x1e0   : > { %v1061_v0 = vld [vmem:[%s3784_s22] sm:$0xff] (!%p2198_p7)  ;;  %vm1064_vm0 = vcmask (!%p2198_p7), 261120   ;;  %v2199_v11 = vld [vmem:[#allocation10] ss:$0 sm:$0xff] (!%p2198_p7)  ;;  %v2200_v13 = vld [vmem:[#allocation11] ss:$0 sm:$0xff] (!%p2198_p7) }
 0x1e1   : > { %s1037_s16 = scalar_select %p1036_p4, %s4221_s19, 1 }
 0x1e2   : > { %1060 = sbr.rel (%p2198_p7) target bundleno = 796 (0x31c), region = 156  ;;  %v1065_v1 = vsel (!%p2198_p7), %vm1064_vm0, %v1061_v0, 0.0 }
 0x1e3   : > { %s2242_s29 = sshll.u32 %s1037_s16, 4  ;;  %s2245_s26 = sshll.u32 %s1037_s16, 5  ;;  %1066 = vadd.xlane.f32.xlu0 (!%p2198_p7), %v1065_v1 }
 0x1e4   : > { %s3877_s8 = scalar_lea.vmem %s4222_s20, %s2242_s29  ;;  %s3882_s2 = scalar_lea.vmem %s4223_s0, %s2242_s29 }
 0x1e5   : > { %s3887_s24 = scalar_lea.vmem %s4224_s3, %s2242_s29  ;;  %s3892_s15 = scalar_lea.vmem %s4225_s13, %s2245_s26 }
 0x1e6   : > { %s4226_s16 = sshll.u32 %s3777_s10, 3 }
 0x1e7   : > { %s3896_s17 = scalar_lea.vmem [#allocation22], %s4226_s16 }
 0x270   : > { %v1067_v2 = vpop.xlane.xlu0 %1066 }
 0x271   : > { %v1069_v3 = vmul.f32 0.03125, %v1067_v2 }
 0x273   : > { %v1070_v4 = vsub.f32 %v1061_v0, %v1069_v3 }
 0x275   : > { %v1071_v5 = vmul.f32 %v1070_v4, %v1070_v4 }
 0x277   : > { %v1072_v6 = vsel %vm1064_vm0, %v1071_v5, 0.0 }
 0x278   : > { %1073 = vadd.xlane.f32.xlu0 %v1072_v6 }
 0x305   : > { %v1074_v7 = vpop.xlane.xlu0 %1073 }
 0x306   : > { %v1075_v8 = vmul.f32 0.03125, %v1074_v7 }
 0x308   : > { %v1076_v9 = vadd.f32 1e-12, %v1075_v8 }
 0x30a   : > { %2539 = vrsqrt.f32 %v1076_v9 }
 0x314   : > { %v2540_v10 = vpop.eup %2539 }
 0x315   : > { %v1078_v12 = vmul.f32 %v2540_v10, %v1070_v4 }
 0x317   : > { %v1085_v14 = vmul.f32 %v2199_v11, %v1078_v12 }
 0x319   : > { %v1092_v15 = vadd.f32 %v2200_v13, %v1085_v14 }
 0x31b   : > { %1093 = vst.msk [vmem:[#allocation2] sm:$0xff] %vm1064_vm0, %v1092_v15 }
 0x31c PF: > { %v2541_v16 = vld [vmem:[%s3877_s8] sm:$0xff]   ;;  %v3142_v17 = vmov 0.0   ;;  %v2542_v18 = vld [vmem:[%s3877_s8 + $0x8] sm:$0xff]   ;;  %vm3143_vm1 = vmmov 0   ;;  %vm1119_vm2 = vcmask 261120   ;;  %s4227_s9 = scalar_lea.vmem [#allocation13], %s3810_s7 }
 0x31d   : > { %2275 = vmatprep.subr.bf16.mxu0 %v3142_v17  ;;  %2283 = vmatprep.subr.bf16.mxu1 %v3142_v17  ;;  %v2201_v21 = vld [vmem:[%s4227_s9] ss:$0 sm:$0xff]  ;;  %vm1164_vm3 = vcmask 781312   ;;  %s3144_s11 = smov 112   ;;  %s3145_s13 = smov 96   ;;  %vm1173_vm4 = vcmask 130048  }
 0x31e   : > { %2276 = vmatpush3.bf16.msra.mxu0 %v2541_v16  ;;  %2279 = vmatprep.mubr.msk.bf16.mxu0 %vm3143_vm1, %v3142_v17  ;;  %s3146_s22 = smov 80   ;;  %s4228_s6 = scalar_lea.vmem [#allocation8], %s3777_s10  ;;  %vm1228_vm5 = vcmask 64512   ;;  %vm1246_vm6 = vcmask 1043456   ;;  %v2545_v9 = vld [vmem:[%s3882_s2] sm:$0xff]   ;;  %vm1291_vm7 = vcmask 125952  }
 0x31f   : > { %2277 = vmatprep.subr.bf16.mxu0 %v3142_v17  ;;  %2285 = vmatprep.mubr.msk.bf16.mxu1 %vm3143_vm1, %v3142_v17  ;;  %v2207_v37 = vld [vmem:[%s4228_s6] ss:$0 sm:$0xff]  ;;  %s3147_s3 = smov 64   ;;  %s3148_s0 = smov 48   ;;  %v2546_v11 = vld [vmem:[%s3882_s2 + $0x8] sm:$0xff]   ;;  %vm1416_vm8 = vcmask 257152  }
 0x320   : > { %s3149_s8 = smov 16   ;;  %s4229_s2 = scalar_lea.vmem [#allocation14], %s3810_s7  ;;  %vm1632_vm9 = vcmask 523264  }
 0x321   : > { %s4230_s20 = scalar_lea.vmem [#allocation15], %s3810_s7  ;;  %s4231_s5 = scalar_lea.vmem [#allocation16], %s3810_s7 }
 0x322   : > { %v3909_v19 = vld [vmem:[#allocation2] sm:$0xff]  ;;  %2278 = vmatpush3.bf16.msra.mxu0 %v2542_v18  ;;  %s4234_s26 = scalar_lea.vmem [#allocation19], %s3810_s7  ;;  %s4235_s1 = scalar_lea.vmem [#allocation20], %s3810_s7 }
 0x323   : > { %v1099_v20 = vpack.c.bf16 %v3909_v19, %v3909_v19  ;;  %2289 = vmatprep.subr.bf16.mxu0 %v3142_v17  ;;  %s4236_s19 = sld [smem:[#allocation40_spill]] }
 0x325   : > { %2280 = vmatmul.mubr.msk.bf16.vlgmr.msra.gmra.mrb[0].mxu0 %vm1119_vm2, %v1099_v20 }
 0x326   : > { %2291 = vmatprep.mubr.msk.bf16.mxu0 %vm3143_vm1, %v3142_v17 }
 0x329   : > { %p2231_p8 = scmp.ne.s32.totalorder %s4236_s19, 1 }
 0x32a   : > { %s4237_s14 = sld [smem:[#allocation68_spill]] (!%p2231_p8)  ;;  %vm3151_vm10 = vmmov (!%p2231_p8), 0  }
 0x3f8   : > { %v1157_v22 = vpop.f32.mrb[0].mxu0 }
 0x3f9   : > { %v1158_v23 = vadd.f32 %v2201_v21, %v1157_v22  ;;  %v2281_v24 = vpop.f32.mrb[1].mxu0 }
 0x3fa   : > { %v1160_v25 = vpop.f32.mrb[2].mxu0 }
 0x3fb   : > { %v1163_v26 = vpack.c.bf16 %v1158_v23, %v1158_v23  ;;  %v2282_v27 = vpop.f32.mrb[3].mxu0  ;;  %v2213_v25 = vld [vmem:[%s4229_s2] ss:$0 sm:$0xff] }
 0x3fd   : > { %1165 = vst.msk [vmem:[#allocation3] sm:$0xf] %vm1164_vm3, %v1163_v26 }
 0x404   : > { %v2543_v28 = vld [vmem:[#allocation3] ss:$0 sps:$4 sm:$0xff]  }
 0x405   : > { %v1167_v29 = vld [vmem:[#allocation3] sm:$0xf]  ;;  %1297 = vrot.lane.b32.xlu1 %v2543_v28, %s3144_s11  ;;  %s4238_s11 = sld [smem:[#allocation70_spill]] (!%p2231_p8) }
 0x406   : > { %v2205_v30 = vcombine.low %v1167_v29, %v1167_v29 }
 0x408   : > { %1171 = vrot.lane.b32.xlu0 %v2205_v30, %s3145_s13 }
 0x40c   : > { %1299 = vrot.lane.b32.xlu0 %v2543_v28, %s3146_s22 }
 0x477   : > { %v1298_v35 = vpop.permute.xlu1 %1297 }
 0x47a   : > { %v1172_v31 = vpop.permute.xlu0 %1171 }
 0x47b   : > { %v1178_v32 = vsel %vm1173_vm4, %v1172_v31, 0 }
 0x47c   : > { %2284 = vmatpush3.bf16.xpose.msra.mxu1 %v1178_v32 }
 0x47d   : > { %2295 = vmatprep.subr.bf16.mxu1 %v3142_v17 }
 0x47e   : > { %v1300_v33 = vpop.permute.xlu0 %1299 }
 0x47f   : > { %v1305_v34 = vsel %vm1173_vm4, %v1300_v33, 0 }
 0x483   : > { %2286 = vmatmul.mubr.msk.bf16.vlgmr.msra.gmra.mrb[0].mxu1 %vm1173_vm4, %v1167_v29 }
 0x484   : > { %2296 = vmatpush3.bf16.xpose.msra.mxu1 %v1305_v34  ;;  %2297 = vmatprep.mubr.msk.bf16.mxu1 %vm3143_vm1, %v3142_v17 }
 0x485   : > { %2307 = vmatprep.subr.bf16.mxu1 %v3142_v17 }
 0x48b   : > { %2298 = vmatmul.mubr.msk.bf16.vlgmr.msra.gmra.mrb[4].mxu1 %vm1173_vm4, %v1298_v35 }
 0x48c   : > { %2311 = vmatprep.mubr.msk.bf16.mxu1 %vm3143_vm1, %v3142_v17  ;;  %2308 = vmatpush3.bf16.msra.mxu1 %v2545_v9 }
 0x48d   : > { %2309 = vmatprep.subr.bf16.mxu1 %v3142_v17 }
 0x490   : > { %2310 = vmatpush3.bf16.msra.mxu1 %v2546_v11 }
 0x491   : > { %2323 = vmatprep.subr.bf16.mxu1 %v3142_v17 }
 0x556   : > { %v1214_v36 = vpop.f32.mrb[0].mxu1 }
 0x557   : > { %v1220_v38 = vmul.f32 0.25, %v1214_v36  ;;  %v2287_v39 = vpop.f32.mrb[1].mxu1 }
 0x558   : > { %v1217_v40 = vpop.f32.mrb[2].mxu1  ;;  %v2548_v39 = vld [vmem:[%s3887_s24 + $0x8] sm:$0xff]  }
 0x559   : > { %v2288_v41 = vpop.f32.mrb[3].mxu1  ;;  %v1227_v42 = vadd.f32 %v2207_v37, %v1220_v38  ;;  %v2547_v38 = vld [vmem:[%s3887_s24] sm:$0xff]   ;;  %s4232_s24 = scalar_lea.vmem [#allocation17], %s3810_s7 }
 0x55b   : > { %v1229_v43 = vsel %vm1228_vm5, %v1227_v42, -inf }
 0x55c   : > { %1230 = vmax.xlane.f32.xlu1 %v1229_v43  ;;  %v2217_v43 = vld [vmem:[%s4230_s20] ss:$0 sm:$0xff] }
 0x55e   : > { %v1341_v44 = vpop.f32.mrb[4].mxu1 }
 0x55f   : > { %v1347_v45 = vmul.f32 0.25, %v1341_v44  ;;  %v2299_v46 = vpop.f32.mrb[5].mxu1 }
 0x560   : > { %v1344_v47 = vpop.f32.mrb[6].mxu1 }
 0x561   : > { %v2300_v48 = vpop.f32.mrb[7].mxu1  ;;  %v1348_v49 = vadd.f32 %v2207_v37, %v1347_v45  ;;  %v2218_v45 = vld [vmem:[%s4231_s5] ss:$0 sm:$0xff] }
 0x563   : > { %v1349_v50 = vsel %vm1228_vm5, %v1348_v49, -inf }
 0x564   : > { %1350 = vmax.xlane.f32.xlu0 %v1349_v50  ;;  %v2550_v50 = vld [vmem:[%s3892_s15 + $0x8] sm:$0xff]  }
 0x5e9   : > { %v1231_v51 = vpop.xlane.xlu1 %1230 }
 0x5ea   : > { %v1232_v52 = vsub.f32 %v1227_v42, %v1231_v51  ;;  %v2551_v51 = vld [vmem:[%s3892_s15 + $0x10] sm:$0xff]  }
 0x5ec   : > { %v1233_v53 = vmul.f32 1.442695, %v1232_v52  ;;  %v2552_v52 = vld [vmem:[%s3892_s15 + $0x18] sm:$0xff]  }
 0x5ee   : > { %2553 = vpow2.f32 %v1233_v53  ;;  %v2219_v53 = vld [vmem:[%s4232_s24] ss:$0 sm:$0xff] }
 0x5f1   : > { %v1351_v54 = vpop.xlane.xlu0 %1350 }
 0x5f2   : > { %v1352_v55 = vsub.f32 %v1348_v49, %v1351_v54  ;;  %v2549_v49 = vld [vmem:[%s3892_s15] sm:$0xff]   ;;  %s4233_s15 = scalar_lea.vmem [#allocation18], %s3810_s7 }
 0x5f4   : > { %v1353_v56 = vmul.f32 1.442695, %v1352_v55 }
 0x5f6   : > { %2555 = vpow2.f32 %v1353_v56 }
 0x5f8   : > { %v2554_v57 = vpop.eup %2553 }
 0x5f9   : > { %v1235_v58 = vsel %vm1228_vm5, %v2554_v57, 0.0 }
 0x5fa   : > { %1236 = vadd.xlane.f32.xlu0 %v1235_v58 }
 0x600   : > { %v2556_v59 = vpop.eup %2555 }
 0x601   : > { %v1355_v60 = vsel %vm1228_vm5, %v2556_v59, 0.0 }
 0x602   : > { %1356 = vadd.xlane.f32.xlu1 %v1355_v60 }
 0x610   : > { %1241 = vrot.lane.b32.xlu0 %v2205_v30, %s3147_s3 }
 0x613   : > { %1361 = vrot.lane.b32.xlu1 %v2543_v28, %s3148_s0  ;;  %s4239_s0 = sld [smem:[#allocation71_spill]] (!%p2231_p8) }
 0x687   : > { %v1237_v61 = vpop.xlane.xlu0 %1236 }
 0x688   : > { %2557 = vrcp.f32 %v1237_v61 }
 0x68b   : > { %v1242_v62 = vpop.permute.xlu0 %1241 }
 0x68c   : > { %v1248_v63 = vsel %vm1246_vm6, %v1242_v62, 0 }
 0x68d   : > { %2290 = vmatpush3.bf16.msra.mxu0 %v1248_v63 }
 0x68e   : > { %2301 = vmatprep.subr.bf16.mxu0 %v3142_v17 }
 0x68f   : > { %v1357_v0 = vpop.xlane.xlu1 %1356 }
 0x690   : > { %2559 = vrcp.f32 %v1357_v0 }
 0x692   : > { %v2558_v1 = vpop.eup %2557 }
 0x693   : > { %v1239_v2 = vmul.f32 %v2558_v1, %v2554_v57  ;;  %v1362_v3 = vpop.permute.xlu1 %1361 }
 0x694   : > { %v1367_v5 = vsel %vm1246_vm6, %v1362_v3, 0 }
 0x695   : > { %v1240_v4 = vpack.c.bf16 %v1239_v2, %v1239_v2 }
 0x697   : > { %2292 = vmatmul.mubr.msk.bf16.vlgmr.msra.gmra.mrb[4].mxu0 %vm1228_vm5, %v1240_v4  ;;  %v2223_v4 = vld [vmem:[%s4233_s15] ss:$0 sm:$0xff] }
 0x698   : > { %2302 = vmatpush3.bf16.msra.mxu0 %v1367_v5  ;;  %2303 = vmatprep.mubr.msk.bf16.mxu0 %vm3143_vm1, %v3142_v17 }
 0x699   : > { %2315 = vmatprep.subr.bf16.mxu0 %v3142_v17 }
 0x69a   : > { %v2560_v6 = vpop.eup %2559 }
 0x69b   : > { %v1359_v7 = vmul.f32 %v2560_v6, %v2556_v59 }
 0x69d   : > { %v1360_v8 = vpack.c.bf16 %v1359_v7, %v1359_v7 }
 0x69f   : > { %2304 = vmatmul.mubr.msk.bf16.vlgmr.msra.gmra.mrb[8].mxu0 %vm1228_vm5, %v1360_v8 }
 0x6a0   : > { %2319 = vmatprep.mubr.msk.bf16.mxu0 %vm3143_vm1, %v3142_v17  ;;  %2316 = vmatpush3.bf16.msra.mxu0 %v2547_v38 }
 0x6a1   : > { %2317 = vmatprep.subr.bf16.mxu0 %v3142_v17 }
 0x6a4   : > { %2318 = vmatpush3.bf16.msra.mxu0 %v2548_v39 }
 0x76a   : > { %v1284_v10 = vpop.f32.mrb[4].mxu0 }
 0x76b   : > { %v1290_v12 = vpack.c.bf16 %v1284_v10, %v1284_v10  ;;  %v2293_v13 = vpop.f32.mrb[5].mxu0 }
 0x76c   : > { %v1287_v14 = vpop.f32.mrb[6].mxu0 }
 0x76d   : > { %1292 = vst.msk [vmem:[#allocation4] sm:$0xf] %vm1291_vm7, %v1290_v12  ;;  %v2294_v15 = vpop.f32.mrb[7].mxu0 }
 0x772   : > { %v1403_v16 = vpop.f32.mrb[8].mxu0 }
 0x773   : > { %v2246_v18 = vpack.c.bf16 %v1403_v16, %v1403_v16  ;;  %v2305_v20 = vpop.f32.mrb[9].mxu0 }
 0x774   : > { %v1406_v21 = vpop.f32.mrb[10].mxu0 }
 0x775   : > { %1413 = vrot.lane.b32.xlu1 %v2246_v18, %s3149_s8  ;;  %v2306_v22 = vpop.f32.mrb[11].mxu0 }
 0x7e7   : > { %v1414_v23 = vpop.permute.xlu1 %1413 }
 0x7e8   : > { %1417 = vst.msk [vmem:[#allocation4] sm:$0xf] %vm1416_vm8, %v1414_v23  ;;  %v2229_v23 = vld [vmem:[%s4234_s26] ss:$0 sm:$0xff] }
 0x7ef   : > { %v1418_v24 = vld [vmem:[#allocation4] sm:$0xf] }
 0x7f0   : > { %2312 = vmatmul.mubr.msk.bf16.vlgmr.msra.gmra.mrb[8].mxu1 %vm1119_vm2, %v1418_v24 }
 0x7f1   : > { %2331 = vmatprep.mubr.msk.bf16.mxu1 %vm3143_vm1, %v3142_v17  ;;  %2324 = vmatpush3.bf16.msra.mxu1 %v2549_v49 }
 0x7f2   : > { %2325 = vmatprep.subr.bf16.mxu1 %v3142_v17 }
 0x7f5   : > { %2326 = vmatpush3.bf16.msra.mxu1 %v2550_v50 }
 0x7f6   : > { %2327 = vmatprep.subr.bf16.mxu1 %v3142_v17 }
 0x7f9   : > { %2328 = vmatpush3.bf16.msra.mxu1 %v2551_v51 }
 0x7fa   : > { %2329 = vmatprep.subr.bf16.mxu1 %v3142_v17 }
 0x7fd   : > { %2330 = vmatpush3.bf16.msra.mxu1 %v2552_v52 }
 0x8c3   : > { %v1479_v26 = vpop.f32.mrb[8].mxu1 }
 0x8c4   : > { %v1480_v27 = vadd.f32 %v2213_v25, %v1479_v26  ;;  %v2313_v28 = vpop.f32.mrb[9].mxu1  ;;  %v2230_v25 = vld [vmem:[%s4235_s1] ss:$0 sm:$0xff] }
 0x8c5   : > { %v1482_v29 = vpop.f32.mrb[10].mxu1  ;;  %v2567_v28 = vld [vmem:[%s4237_s14] sm:$0xff] (!%p2231_p8)  }
 0x8c6   : > { %v2314_v30 = vpop.f32.mrb[11].mxu1  ;;  %v1485_v31 = vadd.f32 %v1480_v27, %v3909_v19  ;;  %v3150_v29 = vmov (!%p2231_p8), 0.0  }
 0x8c7   : > { %2335 = vmatprep.subr.bf16.mxu0 (!%p2231_p8), %v3150_v29  ;;  %2343 = vmatprep.subr.bf16.mxu1 (!%p2231_p8), %v3150_v29  ;;  %v2568_v30 = vld [vmem:[%s4237_s14 + $0x8] sm:$0xff] (!%p2231_p8)  }
 0x8c8   : > { %v1488_v32 = vsel %vm1119_vm2, %v1485_v31, 0.0 }
 0x8c9   : > { %1489 = vadd.xlane.f32.xlu0 %v1488_v32  ;;  %v2569_v32 = vld [vmem:[%s4238_s11] sm:$0xff] (!%p2231_p8)  }
 0x956   : > { %v1490_v33 = vpop.xlane.xlu0 %1489 }
 0x957   : > { %v1492_v34 = vmul.f32 0.03125, %v1490_v33  ;;  %v2570_v33 = vld [vmem:[%s4238_s11 + $0x8] sm:$0xff] (!%p2231_p8)  }
 0x959   : > { %v1493_v35 = vsub.f32 %v1485_v31, %v1492_v34  ;;  %v1716_v34 = vld [vmem:[#allocation21] sm:$0x1] (!%p2231_p8) }
 0x95b   : > { %v1494_v36 = vmul.f32 %v1493_v35, %v1493_v35 }
 0x95d   : > { %v1495_v37 = vsel %vm1119_vm2, %v1494_v36, 0.0 }
 0x95e   : > { %1496 = vadd.xlane.f32.xlu1 %v1495_v37 }
 0x9eb   : > { %v1497_v19 = vpop.xlane.xlu1 %1496 }
 0x9ec   : > { %v1498_v40 = vmul.f32 0.03125, %v1497_v19 }
 0x9ee   : > { %v1499_v41 = vadd.f32 1e-12, %v1498_v40 }
 0x9f0   : > { %2561 = vrsqrt.f32 %v1499_v41  ;;  %v1834_v41 = vlaneseq (!%p2231_p8) }
 0x9fa   : > { %v2562_v42 = vpop.eup %2561 }
 0x9fb   : > { %v1501_v44 = vmul.f32 %v2562_v42, %v1493_v35  ;;  %v1835_v42 = vshrl.u32 (!%p2231_p8), %v1834_v41, 7 }
 0x9fd   : > { %v1508_v46 = vmul.f32 %v2217_v43, %v1501_v44  ;;  %v1778_v43 = vld [vmem:[%s4239_s0] sm:$0x1] (!%p2231_p8)  ;;  %v1836_v44 = vsub.s32 (!%p2231_p8), 0, %v1835_v42 }
 0x9ff   : > { %v1515_v47 = vadd.f32 %v2218_v45, %v1508_v46 }
 0xa01   : > { %v1520_v48 = vpack.c.bf16 %v1515_v47, %v1515_v47 }
 0xa03   : > { %2320 = vmatmul.mubr.msk.bf16.vlgmr.msra.gmra.mrb[12].mxu0 %vm1119_vm2, %v1520_v48 }
 0xa04   : > { %2336 = vmatpush3.bf16.msra.mxu0 (!%p2231_p8), %v2567_v28  ;;  %2339 = vmatprep.mubr.msk.bf16.mxu0 (!%p2231_p8), %vm3151_vm10, %v3150_v29 }
 0xa05   : > { %2337 = vmatprep.subr.bf16.mxu0 (!%p2231_p8), %v3150_v29 }
 0xa08   : > { %2338 = vmatpush3.bf16.msra.mxu0 (!%p2231_p8), %v2568_v30 }
 0xad6   : > { %v1577_v54 = vpop.f32.mrb[12].mxu0 }
 0xad7   : > { %v1578_v55 = vadd.f32 %v2219_v53, %v1577_v54  ;;  %v2321_v56 = vpop.f32.mrb[13].mxu0 }
 0xad8   : > { %v1580_v57 = vpop.f32.mrb[14].mxu0 }
 0xad9   : > { %v1584_v58 = vmul.f32 0.044715, %v1578_v55  ;;  %v2322_v59 = vpop.f32.mrb[15].mxu0  ;;  %v1583_v1 = vmul.f32 0.5, %v1578_v55 }
 0xadb   : > { %v1585_v60 = vmul.f32 %v1584_v58, %v1578_v55 }
 0xadd   : > { %v1586_v61 = vmul.f32 %v1585_v60, %v1578_v55 }
 0xadf   : > { %v1587_v62 = vadd.f32 %v1586_v61, %v1578_v55 }
 0xae1   : > { %v1588_v63 = vmul.f32 0.7978846, %v1587_v62 }
 0xae3   : > { %2563 = vtanh.f32 %v1588_v63 }
 0xaed   : > { %v2564_v0 = vpop.eup %2563 }
 0xaee   : > { %v1590_v2 = vadd.f32 1.0, %v2564_v0 }
 0xaf0   : > { %v1591_v3 = vmul.f32 %v1590_v2, %v1583_v1 }
 0xaf2   : > { %v1600_v17 = vpack.c.bf16 %v1591_v3, %v1591_v3 }
 0xaf4   : > { %2332 = vmatmul.mubr.msk.bf16.vlgmr.msra.gmra.mrb[12].mxu1 %vm1632_vm9, %v1600_v17 }
 0xaf5   : > { %2347 = vmatprep.mubr.msk.bf16.mxu1 (!%p2231_p8), %vm3151_vm10, %v3150_v29  ;;  %2344 = vmatpush3.bf16.msra.mxu1 (!%p2231_p8), %v2569_v32 }
 0xaf6   : > { %2345 = vmatprep.subr.bf16.mxu1 (!%p2231_p8), %v3150_v29 }
 0xaf9   : > { %2346 = vmatpush3.bf16.msra.mxu1 (!%p2231_p8), %v2570_v33 }
 0xbc7   : > { %v1670_v5 = vpop.f32.mrb[12].mxu1 }
 0xbc8   : > { %v1671_v6 = vadd.f32 %v2223_v4, %v1670_v5  ;;  %v2333_v7 = vpop.f32.mrb[13].mxu1 }
 0xbc9   : > { %v1673_v8 = vpop.f32.mrb[14].mxu1 }
 0xbca   : > { %v2334_v9 = vpop.f32.mrb[15].mxu1  ;;  %v1676_v10 = vadd.f32 %v1671_v6, %v1515_v47 }
 0xbcc   : > { %v1679_v11 = vsel %vm1119_vm2, %v1676_v10, 0.0 }
 0xbcd   : > { %1680 = vadd.xlane.f32.xlu0 %v1679_v11 }
 0xc5a   : > { %v1681_v12 = vpop.xlane.xlu0 %1680 }
 0xc5b   : > { %v1682_v13 = vmul.f32 0.03125, %v1681_v12 }
 0xc5d   : > { %v1683_v14 = vsub.f32 %v1676_v10, %v1682_v13 }
 0xc5f   : > { %v1684_v15 = vmul.f32 %v1683_v14, %v1683_v14 }
 0xc61   : > { %v1685_v16 = vsel %vm1119_vm2, %v1684_v15, 0.0 }
 0xc62   : > { %1686 = vadd.xlane.f32.xlu0 %v1685_v16 }
 0xcef   : > { %v1687_v18 = vpop.xlane.xlu0 %1686 }
 0xcf0   : > { %v1688_v20 = vmul.f32 0.03125, %v1687_v18 }
 0xcf2   : > { %v1689_v21 = vadd.f32 1e-12, %v1688_v20 }
 0xcf4   : > { %2565 = vrsqrt.f32 %v1689_v21 }
 0xcfe   : > { %v2566_v22 = vpop.eup %2565 }
 0xcff   : > { %v1691_v24 = vmul.f32 %v2566_v22, %v1683_v14  ;;  %1710 = sbr.rel (%p2231_p8) target bundleno = 3779 (0xec3), region = 160 }
 0xd01   : > { %v1698_v26 = vmul.f32 %v2229_v23, %v1691_v24 }
 0xd03   : > { %v1705_v27 = vadd.f32 %v2230_v25, %v1698_v26 }
 0xd05   : > { %1706 = vst.msk [vmem:[#allocation2] sm:$0xff] %vm1119_vm2, %v1705_v27  ;;  %v1715_v31 = vpack.c.bf16 (!%p2231_p8), %v1705_v27, %v1705_v27 }
 0xd07   : > { %2340 = vmatmul.mubr.msk.bf16.vlgmr.msra.gmra.mrb[0].mxu0 %vm1119_vm2, %v1715_v31 }
 0xdda   : > { %v1766_v35 = vpop.f32.mrb[0].mxu0 }
 0xddb   : > { %v1767_v36 = vadd.f32 %v1766_v35, %v1716_v34  ;;  %v2341_v37 = vpop.f32.mrb[1].mxu0 }
 0xddc   : > { %v1769_v38 = vpop.f32.mrb[2].mxu0 }
 0xddd   : > { %2571 = vtanh.f32 %v1767_v36  ;;  %v2342_v39 = vpop.f32.mrb[3].mxu0 }
 0xde7   : > { %v2572_v19 = vpop.eup %2571 }
 0xde8   : > { %v1777_v40 = vpack.c.bf16 %v2572_v19, %v2572_v19 }
 0xdea   : > { %2348 = vmatmul.mubr.msk.bf16.vlgmr.msra.gmra.mrb[0].mxu1 %vm1119_vm2, %v1777_v40 }
 0xebd   : > { %v1828_v45 = vpop.f32.mrb[0].mxu1 }
 0xebe   : > { %v1829_v46 = vadd.f32 %v1828_v45, %v1778_v43  ;;  %v2349_v47 = vpop.f32.mrb[1].mxu1 }
 0xebf   : > { %v1831_v48 = vpop.f32.mrb[2].mxu1 }
 0xec0   : > { %v1837_v49 = vrot.slane %v1829_v46, %v1836_v44  ;;  %v2350_v50 = vpop.f32.mrb[3].mxu1 }
 0xec2   : > { %1838 = vst [vmem:[%s3896_s17] sm:$0xff] %v1837_v49 }
 0xec3 PF: > { %s4240_s8 = sld [smem:[#allocation41_spill]]  ;;  %s4241_s2 = sld [smem:[#allocation50_spill]] }
 0xec4   : > { %s4242_s15 = sld [smem:[#allocation72_spill]]  ;;  %s1853_s1 = sshll.u32 %s3896_s17, 4  ;;  %s1854_s1 = int_to_ptr.vmem [resolvable:$true] %s1853_s1 }
 0xec5   : > { %s1840_s19 = scalar_lea.sflag [#allocation7], %s3777_s10  ;;  %s2957_s29 = scalar_lea.vmem %s1854_s1, 128 }
 0xec6   : > { %p2958_p6 = scmp.ne.s32.totalorder %s1854_s1, %s2957_s29  ;;  %s3152_s30 = smov [#allocation22]  }
 0xec7   : > { %s2961_s12 = sshll.u32 %s3152_s30, 4  ;;  %s2962_s12 = int_to_ptr.vmem [resolvable:$false] %s2961_s12 }
 0xec8   : > { %s2963_s16 = scalar_lea.vmem %s2962_s12, 256  ;;  %p2964_p9 = scmp.lt.s32.totalorder %s1854_s1, %s2962_s12 }
 0xec9   : > { %s2239_s20 = sshll.u32 %s4240_s8, 7  ;;  %p4243_p12 = scmp.ne.s32.totalorder %s4241_s2, 0 }
 0xeca   : > { %s4003_s26 = scalar_lea.hbm %s4242_s15, %s2239_s20  ;;  %p2965_p2 = scmp.lt.s32.totalorder %s2963_s16, %s2957_s29 }
 0xecb   : > { %p2959_p0 = pnand %p2958_p6, %p4243_p12 }
 0xecc   : > { %p2966_p10 = por %p2965_p2, %p2964_p9 }
 0xecd   : > { %p2960_p11 = pneg %p2959_p0 }
 0xecf   : > { %p2967_p3 = pnand %p2966_p10, %p2960_p11 }
 0xed1   : > { %2970 = shalt.err (!%p2967_p3)
}
 0xed2   : > { %s2971_s17 = scalar_lea.hbm %s4003_s26, 128  ;;  %s2975_s9 = scalar_lea.hbm %s4242_s15, 256 }
 0xed3   : > { %p2972_p5 = scmp.ne.s32.totalorder %s4003_s26, %s2971_s17  ;;  %p2976_p4 = scmp.lt.u32.totalorder %s4003_s26, %s4242_s15 }
 0xed4   : > { %p2977_p7 = scmp.lt.u32.totalorder %s2975_s9, %s2971_s17  ;;  %p2979_p6 = scmp.lt.u32.totalorder %s2971_s17, %s4003_s26 }
 0xed5   : > { %p2973_p13 = pnand %p2972_p5, %p4243_p12 }
 0xed6   : > { %p2978_p8 = por %p2977_p7, %p2976_p4 }
 0xed7   : > { %p2974_p1 = pneg %p2973_p13 }
 0xed8   : > { %p2980_p0 = por %p2979_p6, %p2978_p8 }
 0xeda   : > { %p2981_p11 = pnand %p2980_p0, %p2974_p1 }
 0xedc   : > { %2984 = shalt.err (!%p2981_p11)
}
 0xedd   : > { %2383 = dma.vmem_to_hbm [thread:$0]  (%p4243_p12), %s1854_s1, 128, %s4003_s26, %s1840_s19  }
 0xede PF: > { %s4244_s6 = sld [smem:[#allocation38_spill]]  ;;  %p2437_p9 = scmp.ge.s32.totalorder %s3127_s4, 2 }
 0xedf   : > { %s4245_s3 = sld [smem:[#allocation51_spill]] }
 0xee4   : > { %s1865_s0 = sand.u32 1, %s4244_s6  }
 0xee5   : > { %p4246_p2 = scmp.ne.s32.totalorder %s4245_s3, 0  ;;  %s1866_s8 = scalar_lea.sflag [#allocation7], %s1865_s0 }
 0xee7   : > { %p2427_p10 = pnand %p2437_p9, %p4246_p2 }
 0xee9   : > { %3082 = dma.done.wait (!%p2427_p10), %s1866_s8, 128  }
 0xeea   : > { %3084 = vsyncadd (!%p2427_p10), %s1866_s8, 4294967168  ;;  %s40_s4 = sadd.s32 1, %s3127_s4   ;;  %s4247_s1 = sld [smem:[#allocation37_spill]] }
 0xeeb   : > { %p37_p3 = scmp.ge.s32.totalorder %s40_s4, 6   ;;  %s4248_s20 = sld [smem:[#allocation48_spill]] }
 0xeec   : > { %s4249_s24 = sld [smem:[#allocation39_spill]]  ;;  %s4250_s5 = sld [smem:[#allocation49_spill]] }
 0xeed   : > { %s4251_s19 = sld [smem:[#allocation45_spill]]  ;;  %s4252_s29 = sld [smem:[#allocation47_spill]] }
 0xeee   : > { %s4253_s22 = smov %s3095_s23  ;;  %s4255_s2 = smov %s3107_s25 }
 0xeef   : > { %s4257_s3 = smov %s3119_s27  ;;  %s4258_s26 = smov %s3123_s28 }
 0xef0   :  { %39 = sbr.rel (!%p37_p3) target bundleno = 34 (0x22), region = 278 }
 0xef1   : > { %s4254_s23 = smov %s4248_s20 }
 0xef2   : > { %s4256_s25 = smov %s4250_s5 }
 0xef3   : > { %s4259_s27 = smov %s4251_s19  ;;  %s4260_s28 = smov %s4252_s29 }
 0xef7   :  { %1871 = vsyncpa [#allocation6], 1 }
 0xef8   :  { %1873 = vsyncpa [#allocation6 + $0x1], 1 }
 0xef9   :  { %1874 = vsyncpa [#allocation9], 1 }
 0xefa   :  { %1876 = vsyncpa [#allocation9 + $0x1], 1 }
 0xefb   :  { %1877 = vsyncpa [#allocation12], 1 }
 0xefc   :  { %1878 = vsyncpa [#allocation7], 1 }
 0xefd   :  { %1880 = vsyncpa [#allocation7 + $0x1], 1 }

</bundles_post_ra>
